<compile_context>
chip_gen: v6e
topology: v6e:2x2x1
jax: 0.10.0
libtpu: 0.0.40
codegen_flags: <defaults>
</compile_context>

<pallas_src>
import jax
import jax.numpy as jnp
from jax import lax
from jax.experimental import pallas as pl
from jax.experimental.pallas import tpu as pltpu


def bottleneck_kernel(x_ref, xtop_ref, xbot_ref, w1_ref, b1_ref, w2_ref,
                      b2_ref, w3_ref, b3_ref, o_ref):
    """One (batch, row-tile) step of the Bottleneck forward pass."""
    _, TH, W, Cin = x_ref.shape
    Cb = w1_ref.shape[1]
    Cout = w3_ref.shape[1]
    cd = w1_ref.dtype                      # matmul compute dtype (bf16 or f32)

    t = pl.program_id(1)
    n_t = pl.num_programs(1)

    x_main = x_ref[0]                                        # (TH, W, Cin) f32
    x_full = jnp.concatenate([xtop_ref[0], x_main, xbot_ref[0]], axis=0)  # (TH+2, W, Cin)

    # conv_down_project (1x1 == channel matmul; BN scale folded into w1) + bias + ReLU.
    h1 = jnp.dot(x_full.reshape((TH + 2) * W, Cin).astype(cd), w1_ref[...],
                 preferred_element_type=jnp.float32)
    h1 = jnp.maximum(h1 + b1_ref[...], 0.0).reshape(TH + 2, W, Cb)

    # Halo rows that fall outside the image are the 3x3 conv's zero padding.
    row = lax.broadcasted_iota(jnp.int32, (TH + 2, W, Cb), 0)
    h1 = jnp.where((row == 0) & (t == 0), 0.0, h1)
    h1 = jnp.where((row == TH + 1) & (t == n_t - 1), 0.0, h1)

    # Column taps via XLU roll; zero the column that wrapped around.
    col = lax.broadcasted_iota(jnp.int32, (TH + 2, W, Cb), 1)
    h1_m1 = jnp.where(col == 0, 0.0, pltpu.roll(h1, shift=1, axis=1))          # x[:, j-1]
    h1_p1 = jnp.where(col == W - 1, 0.0, pltpu.roll(h1, shift=W - 1, axis=1))  # x[:, j+1]
    taps = (h1_m1, h1, h1_p1)                                # dx = 0, 1, 2

    if Cb < 128:
        # im2col within the tile: one MXU matmul with K = 9*Cb.
        slab = jnp.concatenate(
            [taps[dx][dy:dy + TH] for dy in range(3) for dx in range(3)],
            axis=-1)                                         # (TH, W, 9*Cb)
        acc = jnp.dot(slab.reshape(TH * W, 9 * Cb).astype(cd), w2_ref[...],
                      preferred_element_type=jnp.float32)
    else:
        acc = jnp.zeros((TH * W, Cb), jnp.float32)
        for dy in range(3):
            for dx in range(3):
                k = dy * 3 + dx
                patch = taps[dx][dy:dy + TH].reshape(TH * W, Cb)
                acc = acc + jnp.dot(patch.astype(cd),
                                    w2_ref[k * Cb:(k + 1) * Cb, :],
                                    preferred_element_type=jnp.float32)
    h2 = jnp.maximum(acc + b2_ref[...], 0.0)                 # (TH*W, Cb)

    # conv_up_project (1x1) + bias + ReLU.
    h3 = jnp.dot(h2.astype(cd), w3_ref[...], preferred_element_type=jnp.float32)
    h3 = jnp.maximum(h3 + b3_ref[...], 0.0)                  # (TH*W, Cout)

    # Dropout2d(p=0.0) is identity; projection is None (Cout == Cin, no resample).
    o_ref[0] = (h3.reshape(TH, W, Cout) + x_main).astype(o_ref.dtype)


def _pick_tile_rows(H, W, cin, cb, max_block_rows=2048,
                    act_budget_bytes=6 * 1024 * 1024):
    """Largest divisor of H whose per-step activations stay VMEM-friendly."""
    bytes_per_row = 4 * W * (2 * cin + 13 * cb)  # x, h1 + 2 rolls, im2col slab, h2
    best = 1
    for th in range(1, H + 1):
        if H % th:
            continue
        if th * W <= max_block_rows and (th + 2) * bytes_per_row <= act_budget_bytes:
            best = th
    return best


def bottleneck_forward_nhwc(x, folded_params, *, tile_rows=None,
                            vmem_limit_bytes=32 * 1024 * 1024):
    """x: (B, H, W, Cin) float32 -> (B, H, W, Cin)."""
    B, H, W, Cin = x.shape
    w1, b1, w2, b2, w3, b3 = folded_params
    Cb = w1.shape[1]
    Cout = w3.shape[1]
    assert Cout == Cin, "default Bottleneck: projection is None (out_channels == in_channels)"

    TH = tile_rows if tile_rows is not None else _pick_tile_rows(H, W, Cin, Cb)
    assert H % TH == 0, f"tile_rows={TH} must divide H={H}"
    n_row_tiles = H // TH

    def fixed(shape):
        return pl.BlockSpec(shape, lambda b, t: (0,) * len(shape))

    grid_spec = pltpu.PrefetchScalarGridSpec(
        num_scalar_prefetch=0,
        grid=(B, n_row_tiles),
        in_specs=[
            # current TH-row tile of x
            pl.BlockSpec((1, TH, W, Cin), lambda b, t: (b, t, 0, 0)),
            # 1-row halos above / below (clamped at the border, masked in-kernel)
            pl.BlockSpec((1, 1, W, Cin),
                         lambda b, t: (b, jnp.maximum(t * TH - 1, 0), 0, 0)),
            pl.BlockSpec((1, 1, W, Cin),
                         lambda b, t: (b, jnp.minimum((t + 1) * TH, H - 1), 0, 0)),
            fixed(w1.shape), fixed(b1.shape),
            fixed(w2.shape), fixed(b2.shape),
            fixed(w3.shape), fixed(b3.shape),
        ],
        out_specs=pl.BlockSpec((1, TH, W, Cout), lambda b, t: (b, t, 0, 0)),
    )
    # TODO(synk): optional lane-dense (B, H, W*C) output view when W*C % 128 == 0
    # was skipped (needs an in-kernel relayout crossing the (8,128) tile).
    return pl.pallas_call(
        bottleneck_kernel,
        out_shape=jax.ShapeDtypeStruct((B, H, W, Cout), x.dtype),
        grid_spec=grid_spec,
        compiler_params=pltpu.CompilerParams(
            dimension_semantics=("parallel", "parallel"),
            vmem_limit_bytes=vmem_limit_bytes),
    )(x, x, x, w1, b1, w2, b2, w3, b3)


def fold_params(params, compute_dtype=jnp.bfloat16):
    """Fold BN scales into conv weights; return matmul-ready, dtype-cast params."""
    w1, s1, b1, w2, s2, b2, w3, s3, b3 = params
    cb = w1.shape[1]
    w1f = (w1 * s1).astype(compute_dtype)                                  # (Cin, Cb)
    w2f = (w2 * s2.reshape(1, 1, 1, cb)).reshape(9 * cb, cb).astype(compute_dtype)
    w3f = (w3 * s3).astype(compute_dtype)                                  # (Cb, Cout)
    return (w1f, b1.astype(jnp.float32), w2f, b2.astype(jnp.float32),
            w3f, b3.astype(jnp.float32))


def bottleneck_forward_nchw(x_nchw, params, *, compute_dtype=jnp.bfloat16,
                            tile_rows=None):
    """PyTorch-convention entry point: NCHW in, NCHW out."""
    folded = fold_params(params, compute_dtype)
    x_nhwc = jnp.transpose(x_nchw, (0, 2, 3, 1))
    y_nhwc = bottleneck_forward_nhwc(x_nhwc, folded, tile_rows=tile_rows)
    return jnp.transpose(y_nhwc, (0, 3, 1, 2))


def ref_forward_nhwc(x, params):
    """Pure-JAX reference of the same forward pass (for validation)."""
    w1, s1, b1, w2, s2, b2, w3, s3, b3 = params
    h = jnp.einsum("bhwc,cd->bhwd", x, w1)
    h = jnp.maximum(h * s1 + b1, 0.0)
    h = lax.conv_general_dilated(h, w2, window_strides=(1, 1), padding="SAME",
                                 dimension_numbers=("NHWC", "HWIO", "NHWC"))
    h = jnp.maximum(h * s2 + b2, 0.0)
    h = jnp.einsum("bhwc,cd->bhwd", h, w3)
    h = jnp.maximum(h * s3 + b3, 0.0)
    return h + x


def make_params(key, in_channels):
    cb = in_channels // 2
    cout = in_channels
    eps = 1e-5
    ks = jax.random.split(key, 12)

    def bn(scale_key, shift_key, c):
        gamma = 1.0 + 0.1 * jax.random.normal(scale_key, (c,), jnp.float32)
        beta = 0.1 * jax.random.normal(shift_key, (c,), jnp.float32)
        mean = 0.05 * jax.random.normal(scale_key, (c,), jnp.float32)
        var = jnp.abs(1.0 + 0.1 * jax.random.normal(shift_key, (c,), jnp.float32))
        scale = gamma / jnp.sqrt(var + eps)
        bias = beta - mean * scale
        return scale.reshape(1, c), bias.reshape(1, c)

    w1 = 0.1 * jax.random.normal(ks[0], (in_channels, cb), jnp.float32)
    s1, b1 = bn(ks[1], ks[2], cb)
    w2 = 0.1 * jax.random.normal(ks[3], (3, 3, cb, cb), jnp.float32)   # HWIO
    s2, b2 = bn(ks[4], ks[5], cb)
    w3 = 0.1 * jax.random.normal(ks[6], (cb, cout), jnp.float32)
    s3, b3 = bn(ks[7], ks[8], cout)
    return (w1, s1, b1, w2, s2, b2, w3, s3, b3)


if __name__ == "__main__":
    key = jax.random.PRNGKey(0)
    k_x, k_p = jax.random.split(key)

    B, C, H, W = 2, 8, 16, 16                 # NCHW, as PyTorch would see it
    x_nchw = jax.random.normal(k_x, (B, C, H, W), jnp.float32)
    params = make_params(k_p, C)

    x_nhwc = jnp.transpose(x_nchw, (0, 2, 3, 1))
    y_ref = jnp.transpose(ref_forward_nhwc(x_nhwc, params), (0, 3, 1, 2))

    # f32 matmul path with tile_rows=8 (2 row tiles -> exercises halo + masking).
    y32 = bottleneck_forward_nchw(x_nchw, params, compute_dtype=jnp.float32,
                                  tile_rows=8)
    y32 = jax.block_until_ready(y32)
    assert y32.shape == (B, C, H, W)
    assert jnp.allclose(y32, y_ref, rtol=1e-3, atol=1e-4), "f32 mismatch vs reference"

    # Default bf16 matmul path (halves matmul-operand traffic, 2x MXU on v6e/v7x).
    ybf = bottleneck_forward_nchw(x_nchw, params, tile_rows=8)
    ybf = jax.block_until_ready(ybf)
    assert ybf.shape == (B, C, H, W)
    assert jnp.allclose(ybf, y_ref, rtol=5e-2, atol=5e-2), "bf16 mismatch vs reference"

    print("KERNEL_OK")
</pallas_src>

<mosaic_0001>
module attributes {stable_mosaic.version = 11 : i64} {
  func.func @bottleneck_kernel(%arg0: i32, %arg1: i32, %arg2: memref<1x8x16x8xf32, #tpu.memory_space<vmem>>, %arg3: memref<1x1x16x8xf32, #tpu.memory_space<vmem>>, %arg4: memref<1x1x16x8xf32, #tpu.memory_space<vmem>>, %arg5: memref<8x4xf32, #tpu.memory_space<vmem>>, %arg6: memref<1x4xf32, #tpu.memory_space<vmem>>, %arg7: memref<36x4xf32, #tpu.memory_space<vmem>>, %arg8: memref<1x4xf32, #tpu.memory_space<vmem>>, %arg9: memref<4x8xf32, #tpu.memory_space<vmem>>, %arg10: memref<1x8xf32, #tpu.memory_space<vmem>>, %arg11: memref<1x8x16x8xf32, #tpu.memory_space<vmem>>) attributes {dimension_semantics = [#tpu.dimension_semantics<parallel>, #tpu.dimension_semantics<parallel>], iteration_bounds = array<i64: 2, 2>, scalar_prefetch = 0 : i64, scratch_operands = 0 : i64, tpu.core_type = #tpu.core_type<tc>, window_params = [{transform_indices = @transform_0, window_bounds = array<i64: 1, 8, 16, 8>}, {transform_indices = @transform_1, window_bounds = array<i64: 1, 1, 16, 8>}, {transform_indices = @transform_2, window_bounds = array<i64: 1, 1, 16, 8>}, {pipeline_mode = #tpu.pipeline_mode<synchronous>, transform_indices = @transform_3, window_bounds = array<i64: 8, 4>}, {pipeline_mode = #tpu.pipeline_mode<synchronous>, transform_indices = @transform_4, window_bounds = array<i64: 1, 4>}, {pipeline_mode = #tpu.pipeline_mode<synchronous>, transform_indices = @transform_5, window_bounds = array<i64: 36, 4>}, {pipeline_mode = #tpu.pipeline_mode<synchronous>, transform_indices = @transform_6, window_bounds = array<i64: 1, 4>}, {pipeline_mode = #tpu.pipeline_mode<synchronous>, transform_indices = @transform_7, window_bounds = array<i64: 4, 8>}, {pipeline_mode = #tpu.pipeline_mode<synchronous>, transform_indices = @transform_8, window_bounds = array<i64: 1, 8>}, {transform_indices = @transform_9, window_bounds = array<i64: 1, 8, 16, 8>}]} {
    %c0 = arith.constant 0 : index
    %c0_0 = arith.constant 0 : index
    %c0_1 = arith.constant 0 : index
    %c0_2 = arith.constant 0 : index
    %0 = vector.load %arg2[%c0, %c0_0, %c0_1, %c0_2] : memref<1x8x16x8xf32, #tpu.memory_space<vmem>>, vector<1x8x16x8xf32>
    %1 = vector.shape_cast %0 : vector<1x8x16x8xf32> to vector<8x16x8xf32>
    %c0_3 = arith.constant 0 : index
    %c0_4 = arith.constant 0 : index
    %c0_5 = arith.constant 0 : index
    %c0_6 = arith.constant 0 : index
    %2 = vector.load %arg3[%c0_3, %c0_4, %c0_5, %c0_6] : memref<1x1x16x8xf32, #tpu.memory_space<vmem>>, vector<1x1x16x8xf32>
    %3 = vector.shape_cast %2 : vector<1x1x16x8xf32> to vector<1x16x8xf32>
    %c0_7 = arith.constant 0 : index
    %c0_8 = arith.constant 0 : index
    %c0_9 = arith.constant 0 : index
    %c0_10 = arith.constant 0 : index
    %4 = vector.load %arg4[%c0_7, %c0_8, %c0_9, %c0_10] : memref<1x1x16x8xf32, #tpu.memory_space<vmem>>, vector<1x1x16x8xf32>
    %5 = vector.shape_cast %4 : vector<1x1x16x8xf32> to vector<1x16x8xf32>
    %6 = tpu.concatenate %3, %1, %5 in 0 : vector<1x16x8xf32>, vector<8x16x8xf32>, vector<1x16x8xf32> -> vector<10x16x8xf32>
    %7 = vector.shape_cast %6 : vector<10x16x8xf32> to vector<160x8xf32>
    %c0_11 = arith.constant 0 : index
    %c0_12 = arith.constant 0 : index
    %8 = vector.load %arg5[%c0_11, %c0_12] : memref<8x4xf32, #tpu.memory_space<vmem>>, vector<8x4xf32>
    %cst = arith.constant dense<0.000000e+00> : vector<160x4xf32>
    %9 = tpu.matmul %7, %8, %cst {dimension_numbers = #tpu.dot_dimension_numbers<[1], [0], [0], [1], [0, 0, 1, 1], [], []>} : vector<160x8xf32>, vector<8x4xf32>, vector<160x4xf32> -> vector<160x4xf32>
    %c0_13 = arith.constant 0 : index
    %c0_14 = arith.constant 0 : index
    %10 = vector.load %arg6[%c0_13, %c0_14] : memref<1x4xf32, #tpu.memory_space<vmem>>, vector<1x4xf32>
    %11 = vector.broadcast %10 : vector<1x4xf32> to vector<160x4xf32>
    %12 = arith.addf %9, %11 : vector<160x4xf32>
    %cst_15 = arith.constant 0.000000e+00 : f32
    %13 = vector.broadcast %cst_15 : f32 to vector<160x4xf32>
    %14 = arith.maximumf %12, %13 : vector<160x4xf32>
    %15 = vector.shape_cast %14 : vector<160x4xf32> to vector<10x16x4xf32>
    %16 = tpu.iota {dimensions = array<i32: 0>} : vector<10x16x4xi32>
    %c0_i32 = arith.constant 0 : i32
    %17 = vector.broadcast %c0_i32 : i32 to vector<10x16x4xi32>
    %18 = arith.cmpi eq, %16, %17 : vector<10x16x4xi32>
    %c0_i32_16 = arith.constant 0 : i32
    %19 = arith.cmpi eq, %arg1, %c0_i32_16 : i32
    %20 = vector.broadcast %19 : i1 to vector<10x16x4xi1>
    %21 = arith.andi %18, %20 : vector<10x16x4xi1>
    %cst_17 = arith.constant 0.000000e+00 : f32
    %22 = vector.broadcast %cst_17 : f32 to vector<10x16x4xf32>
    %23 = arith.select %21, %22, %15 : vector<10x16x4xi1>, vector<10x16x4xf32>
    %c9_i32 = arith.constant 9 : i32
    %24 = vector.broadcast %c9_i32 : i32 to vector<10x16x4xi32>
    %25 = arith.cmpi eq, %16, %24 : vector<10x16x4xi32>
    %c1_i32 = arith.constant 1 : i32
    %26 = arith.cmpi eq, %arg1, %c1_i32 : i32
    %27 = vector.broadcast %26 : i1 to vector<10x16x4xi1>
    %28 = arith.andi %25, %27 : vector<10x16x4xi1>
    %cst_18 = arith.constant 0.000000e+00 : f32
    %29 = vector.broadcast %cst_18 : f32 to vector<10x16x4xf32>
    %30 = arith.select %28, %29, %23 : vector<10x16x4xi1>, vector<10x16x4xf32>
    %31 = tpu.iota {dimensions = array<i32: 1>} : vector<10x16x4xi32>
    %c0_i32_19 = arith.constant 0 : i32
    %32 = vector.broadcast %c0_i32_19 : i32 to vector<10x16x4xi32>
    %33 = arith.cmpi eq, %31, %32 : vector<10x16x4xi32>
    %c1_i32_20 = arith.constant 1 : i32
    %34 = tpu.dynamic_rotate %30 by %c1_i32_20 dim 1 : vector<10x16x4xf32>, i32 -> vector<10x16x4xf32>
    %cst_21 = arith.constant 0.000000e+00 : f32
    %35 = vector.broadcast %cst_21 : f32 to vector<10x16x4xf32>
    %36 = arith.select %33, %35, %34 : vector<10x16x4xi1>, vector<10x16x4xf32>
    %c15_i32 = arith.constant 15 : i32
    %37 = vector.broadcast %c15_i32 : i32 to vector<10x16x4xi32>
    %38 = arith.cmpi eq, %31, %37 : vector<10x16x4xi32>
    %c15_i32_22 = arith.constant 15 : i32
    %39 = tpu.dynamic_rotate %30 by %c15_i32_22 dim 1 : vector<10x16x4xf32>, i32 -> vector<10x16x4xf32>
    %cst_23 = arith.constant 0.000000e+00 : f32
    %40 = vector.broadcast %cst_23 : f32 to vector<10x16x4xf32>
    %41 = arith.select %38, %40, %39 : vector<10x16x4xi1>, vector<10x16x4xf32>
    %42 = vector.extract_strided_slice %36 {offsets = [0, 0, 0], sizes = [8, 16, 4], strides = [1, 1, 1]} : vector<10x16x4xf32> to vector<8x16x4xf32>
    %43 = vector.extract_strided_slice %30 {offsets = [0, 0, 0], sizes = [8, 16, 4], strides = [1, 1, 1]} : vector<10x16x4xf32> to vector<8x16x4xf32>
    %44 = vector.extract_strided_slice %41 {offsets = [0, 0, 0], sizes = [8, 16, 4], strides = [1, 1, 1]} : vector<10x16x4xf32> to vector<8x16x4xf32>
    %45 = vector.extract_strided_slice %36 {offsets = [1, 0, 0], sizes = [8, 16, 4], strides = [1, 1, 1]} : vector<10x16x4xf32> to vector<8x16x4xf32>
    %46 = vector.extract_strided_slice %30 {offsets = [1, 0, 0], sizes = [8, 16, 4], strides = [1, 1, 1]} : vector<10x16x4xf32> to vector<8x16x4xf32>
    %47 = vector.extract_strided_slice %41 {offsets = [1, 0, 0], sizes = [8, 16, 4], strides = [1, 1, 1]} : vector<10x16x4xf32> to vector<8x16x4xf32>
    %48 = vector.extract_strided_slice %36 {offsets = [2, 0, 0], sizes = [8, 16, 4], strides = [1, 1, 1]} : vector<10x16x4xf32> to vector<8x16x4xf32>
    %49 = vector.extract_strided_slice %30 {offsets = [2, 0, 0], sizes = [8, 16, 4], strides = [1, 1, 1]} : vector<10x16x4xf32> to vector<8x16x4xf32>
    %50 = vector.extract_strided_slice %41 {offsets = [2, 0, 0], sizes = [8, 16, 4], strides = [1, 1, 1]} : vector<10x16x4xf32> to vector<8x16x4xf32>
    %51 = tpu.concatenate %42, %43, %44, %45, %46, %47, %48, %49, %50 in 2 : vector<8x16x4xf32>, vector<8x16x4xf32>, vector<8x16x4xf32>, vector<8x16x4xf32>, vector<8x16x4xf32>, vector<8x16x4xf32>, vector<8x16x4xf32>, vector<8x16x4xf32>, vector<8x16x4xf32> -> vector<8x16x36xf32>
    %52 = vector.shape_cast %51 : vector<8x16x36xf32> to vector<128x36xf32>
    %c0_24 = arith.constant 0 : index
    %c0_25 = arith.constant 0 : index
    %53 = vector.load %arg7[%c0_24, %c0_25] : memref<36x4xf32, #tpu.memory_space<vmem>>, vector<36x4xf32>
    %cst_26 = arith.constant dense<0.000000e+00> : vector<128x4xf32>
    %54 = tpu.matmul %52, %53, %cst_26 {dimension_numbers = #tpu.dot_dimension_numbers<[1], [0], [0], [1], [0, 0, 1, 1], [], []>} : vector<128x36xf32>, vector<36x4xf32>, vector<128x4xf32> -> vector<128x4xf32>
    %c0_27 = arith.constant 0 : index
    %c0_28 = arith.constant 0 : index
    %55 = vector.load %arg8[%c0_27, %c0_28] : memref<1x4xf32, #tpu.memory_space<vmem>>, vector<1x4xf32>
    %56 = vector.broadcast %55 : vector<1x4xf32> to vector<128x4xf32>
    %57 = arith.addf %54, %56 : vector<128x4xf32>
    %cst_29 = arith.constant 0.000000e+00 : f32
    %58 = vector.broadcast %cst_29 : f32 to vector<128x4xf32>
    %59 = arith.maximumf %57, %58 : vector<128x4xf32>
    %c0_30 = arith.constant 0 : index
    %c0_31 = arith.constant 0 : index
    %60 = vector.load %arg9[%c0_30, %c0_31] : memref<4x8xf32, #tpu.memory_space<vmem>>, vector<4x8xf32>
    %cst_32 = arith.constant dense<0.000000e+00> : vector<128x8xf32>
    %61 = tpu.matmul %59, %60, %cst_32 {dimension_numbers = #tpu.dot_dimension_numbers<[1], [0], [0], [1], [0, 0, 1, 1], [], []>} : vector<128x4xf32>, vector<4x8xf32>, vector<128x8xf32> -> vector<128x8xf32>
    %c0_33 = arith.constant 0 : index
    %c0_34 = arith.constant 0 : index
    %62 = vector.load %arg10[%c0_33, %c0_34] : memref<1x8xf32, #tpu.memory_space<vmem>>, vector<1x8xf32>
    %63 = vector.broadcast %62 : vector<1x8xf32> to vector<128x8xf32>
    %64 = arith.addf %61, %63 : vector<128x8xf32>
    %cst_35 = arith.constant 0.000000e+00 : f32
    %65 = vector.broadcast %cst_35 : f32 to vector<128x8xf32>
    %66 = arith.maximumf %64, %65 : vector<128x8xf32>
    %67 = vector.shape_cast %66 : vector<128x8xf32> to vector<8x16x8xf32>
    %68 = arith.addf %67, %1 : vector<8x16x8xf32>
    %c0_36 = arith.constant 0 : index
    %c0_37 = arith.constant 0 : index
    %c0_38 = arith.constant 0 : index
    %c0_39 = arith.constant 0 : index
    %69 = vector.load %arg11[%c0_36, %c0_37, %c0_38, %c0_39] : memref<1x8x16x8xf32, #tpu.memory_space<vmem>>, vector<1x8x16x8xf32>
    %70 = vector.shape_cast %69 : vector<1x8x16x8xf32> to vector<8x16x8xf32>
    %71 = vector.shape_cast %68 : vector<8x16x8xf32> to vector<1x8x16x8xf32>
    tpu.vector_store %arg11[%c0_36, %c0_37, %c0_38, %c0_39], %71 {strides = array<i32>} : memref<1x8x16x8xf32, #tpu.memory_space<vmem>>, vector<1x8x16x8xf32>,
    return
  }
  func.func @transform_0(%arg0: i32, %arg1: i32) -> (i32, i32, i32, i32) {
    %c0_i32 = arith.constant 0 : i32
    %c0_i32_0 = arith.constant 0 : i32
    %c0_i32_1 = arith.constant 0 : i32
    return %arg0, %arg1, %c0_i32, %c0_i32_0 : i32, i32, i32, i32
  }
  func.func @transform_1(%arg0: i32, %arg1: i32) -> (i32, i32, i32, i32) {
    %c8_i32 = arith.constant 8 : i32
    %0 = arith.muli %arg1, %c8_i32 : i32
    %c1_i32 = arith.constant 1 : i32
    %1 = arith.subi %0, %c1_i32 : i32
    %c0_i32 = arith.constant 0 : i32
    %2 = arith.maxsi %1, %c0_i32 : i32
    %c0_i32_0 = arith.constant 0 : i32
    %c0_i32_1 = arith.constant 0 : i32
    %c0_i32_2 = arith.constant 0 : i32
    return %arg0, %2, %c0_i32_0, %c0_i32_1 : i32, i32, i32, i32
  }
  func.func @transform_2(%arg0: i32, %arg1: i32) -> (i32, i32, i32, i32) {
    %c1_i32 = arith.constant 1 : i32
    %0 = arith.addi %arg1, %c1_i32 : i32
    %c8_i32 = arith.constant 8 : i32
    %1 = arith.muli %0, %c8_i32 : i32
    %c15_i32 = arith.constant 15 : i32
    %2 = arith.minsi %1, %c15_i32 : i32
    %c0_i32 = arith.constant 0 : i32
    %c0_i32_0 = arith.constant 0 : i32
    %c0_i32_1 = arith.constant 0 : i32
    return %arg0, %2, %c0_i32, %c0_i32_0 : i32, i32, i32, i32
  }
  func.func @transform_3(%arg0: i32, %arg1: i32) -> (i32, i32) {
    %c0_i32 = arith.constant 0 : i32
    %c0_i32_0 = arith.constant 0 : i32
    %c0_i32_1 = arith.constant 0 : i32
    return %c0_i32, %c0_i32_0 : i32, i32
  }
  func.func @transform_4(%arg0: i32, %arg1: i32) -> (i32, i32) {
    %c0_i32 = arith.constant 0 : i32
    %c0_i32_0 = arith.constant 0 : i32
    %c0_i32_1 = arith.constant 0 : i32
    return %c0_i32, %c0_i32_0 : i32, i32
  }
  func.func @transform_5(%arg0: i32, %arg1: i32) -> (i32, i32) {
    %c0_i32 = arith.constant 0 : i32
    %c0_i32_0 = arith.constant 0 : i32
    %c0_i32_1 = arith.constant 0 : i32
    return %c0_i32, %c0_i32_0 : i32, i32
  }
  func.func @transform_6(%arg0: i32, %arg1: i32) -> (i32, i32) {
    %c0_i32 = arith.constant 0 : i32
    %c0_i32_0 = arith.constant 0 : i32
    %c0_i32_1 = arith.constant 0 : i32
    return %c0_i32, %c0_i32_0 : i32, i32
  }
  func.func @transform_7(%arg0: i32, %arg1: i32) -> (i32, i32) {
    %c0_i32 = arith.constant 0 : i32
    %c0_i32_0 = arith.constant 0 : i32
    %c0_i32_1 = arith.constant 0 : i32
    return %c0_i32, %c0_i32_0 : i32, i32
  }
  func.func @transform_8(%arg0: i32, %arg1: i32) -> (i32, i32) {
    %c0_i32 = arith.constant 0 : i32
    %c0_i32_0 = arith.constant 0 : i32
    %c0_i32_1 = arith.constant 0 : i32
    return %c0_i32, %c0_i32_0 : i32, i32
  }
  func.func @transform_9(%arg0: i32, %arg1: i32) -> (i32, i32, i32, i32) {
    %c0_i32 = arith.constant 0 : i32
    %c0_i32_0 = arith.constant 0 : i32
    %c0_i32_1 = arith.constant 0 : i32
    return %arg0, %arg1, %c0_i32, %c0_i32_0 : i32, i32, i32, i32
  }
}

</mosaic_0001>

<bundles_post_ra>
// kernel: tpu_custom_call.1
= control target key start
LH: loop header
LB: loop body
LE: loop exit
PB: predicated region body
PF: predicated region fallthrough
CT: control target
= control target key end

     0   :  { %s2566_s30 = smov 0   ;;  %s2568_s10 = smov 0   ;;  %s3627_s0 = inlined_call_operand.vmem [shape: f32[2,16,16,8], index: 0, kind: input, shape index: {}]   ;;  %s3628_s1 = inlined_call_operand.vmem [shape: f32[2,16,16,8], index: 1, kind: input, shape index: {}]   ;;  %s3629_s2 = inlined_call_operand.vmem [shape: f32[2,16,16,8], index: 2, kind: input, shape index: {}]   ;;  %s3630_s3 = inlined_call_operand.vmem [shape: f32[8,4], index: 3, kind: input, shape index: {}]   ;;  %s3631_s4 = inlined_call_operand.vmem [shape: f32[1,4], index: 4, kind: input, shape index: {}]   ;;  %s3632_s5 = inlined_call_operand.vmem [shape: f32[36,4], index: 5, kind: input, shape index: {}]   ;;  %s3633_s6 = inlined_call_operand.vmem [shape: f32[1,4], index: 6, kind: input, shape index: {}]   ;;  %s3634_s7 = inlined_call_operand.vmem [shape: f32[4,8], index: 7, kind: input, shape index: {}]   ;;  %s3635_s8 = inlined_call_operand.vmem [shape: f32[1,8], index: 8, kind: input, shape index: {}]   ;;  %s3636_s9 = inlined_call_operand.vmem [shape: f32[2,16,16,8], index: 9, kind: output, shape index: {}]  }
   0x1   :  { %s2570_s11 = smov 0   ;;  %s2572_s12 = smov 0  }
   0x2   :  { %s2574_s13 = smov 0  }
   0x3 LB: > { %s28_s14 = sadd.s32 1, %s2498_s11  ;;  %s31_s15 = sadd.s32 1, %s2502_s12  ;;  %s2506_s13 = sphi %s2574_s13, %s19_s13   ;;  %s2502_s12 = sphi %s2572_s12, %s3659_s12   ;;  %s2498_s11 = sphi %s2570_s11, %s3658_s11   ;;  %s2494_s10 = sphi %s2568_s10, %s3657_s10   ;;  %s2490_s30 = sphi %s2566_s30, %s3656_s30  }
   0x4   : > { %p29_p0 = scmp.ge.s32.totalorder %s28_s14, 2  ;;  %p2158_p1 = scmp.ge.s32.totalorder %s2506_s13, 1 }
   0x5   : > { %p373_p2 = scmp.lt.s32.totalorder %s2506_s13, 5 }
   0x6   : > { %s3661_s14 = smov (%p29_p0, %s28_s14), 0  ;;  %s3663_s15 = smov (!%p29_p0, %s31_s15), %s2502_s12 }
   0x7   : > { %p374_p3 = pnand %p2158_p1, %p373_p2  ;;  %p33_p4 = scmp.ge.s32.totalorder %s3663_s15, 2 }
   0x9   : > { %s3665_s15 = smov (%p33_p4, %s3663_s15), 0  ;;  %377 = sbr.rel (%p374_p3) target bundleno = 993 (0x3e1), region = 56 }
   0xe   : > { %v521_v0 = vld [vmem:[%s3630_s3] sm:$0xff]  ;;  %s2602_s18 = sshll.u32 %s2490_s30, 3  ;;  %p446_p5 = scmp.lt.s32.totalorder %s2494_s10, 1  ;;  %vm529_vm0 = vcmask 64512   ;;  %v823_v35 = vlaneseq  ;;  %vm1590_vm6 = vcmask 1043456   ;;  %vm1394_vm7 = vcmask 31744  }
   0xf   : > { %2402 = vmatprep.subr.mxu1 %v521_v0  ;;  %p448_p6 = scmp.lt.s32.totalorder %s2602_s18, 15  ;;  %2310 = vmatprep.subr.mxu0 %v521_v0  ;;  %s2164_s19 = sadd.s32 4294967295, %s2602_s18  ;;  %v2668_v21 = vld [vmem:[%s3631_s4] ss:$0 sm:$0xff]  ;;  %vm1427_vm8 = vcmask 97280   ;;  %vm1444_vm9 = vcmask 130048  }
  0x10   : > { %2403 = vmatpush3.msra.mxu1 %v521_v0  ;;  %s3667_s10 = smov (!%p446_p5, %s2494_s10), 1  ;;  %2311 = vmatpush3.msra.mxu0 %v521_v0  ;;  %p458_p7 = scmp.gt.s32.totalorder %s2164_s19, 0  ;;  %v2700_v42 = vshrl.u32 %v823_v35, 7  ;;  %vm1461_vm10 = vcmask 162816   ;;  %vm1478_vm12 = vcmask 195584   ;;  %vm1495_vm13 = vcmask 228352  }
  0x11   : > { %s449_s20 = scalar_select %p448_p6, %s2602_s18, 15  ;;  %vm1512_vm14 = vcmask 261120   ;;  %vm1541_vm15 = vcmask 293888  }
  0x12   : > { %s2607_s21 = sshll.u32 %s3667_s10, 5  ;;  %p2165_p8 = scmp.lt.s32.totalorder %s2164_s19, 15  ;;  %vm911_vm2 = vcmp.lt.s32.totalorder %v2700_v42, 7  ;;  %vm848_vm3 = vcmp.lt.s32.totalorder %v2700_v42, 1  ;;  %vm826_vm4 = vcmp.eq.s32.totalorder %v2700_v42, 0  ;;  %v2757_v0 = vadd.s32 8, %v2700_v42 }
  0x13   : > { %s2160_s22 = sshll.u32 %s449_s20, 1  ;;  %s3669_s19 = smov (!%p458_p7, %s2164_s19), 0 }
  0x14   : > { %s2610_s23 = sadd.s32 %s2607_s21, %s2160_s22  ;;  %s3671_s19 = smov (!%p2165_p8, %s3669_s19), 15  ;;  %vm890_vm5 = vcmp.eq.s32.totalorder %v2757_v0, 15 }
  0x15   : > { %s3637_s24 = sshll.u32 %s2610_s23, 3  ;;  %s2170_s28 = sshll.u32 %s3671_s19, 1 }
  0x16   : > { %s2618_s27 = scalar_lea.vmem %s3627_s0, %s3637_s24  ;;  %s466_s29 = sadd.s32 %s2170_s28, %s2607_s21 }
  0x17   : > { %v509_v1 = vld [vmem:[%s2618_s27 + $0x40] sm:$0xff]  ;;  %v510_v2 = vld [vmem:[%s2618_s27 + $0x48] sm:$0xff]  ;;  %v511_v3 = vld [vmem:[%s2618_s27 + $0x50] sm:$0xff]  ;;  %s2172_s10 = sshll.u32 %s466_s29, 3  ;;  %s2250_s19 = sadd.s32 8, %s2602_s18 }
  0x18   : > { %2327 = vmatprep.mubr.msk.f32.mxu1 %vm529_vm0, %v509_v1  ;;  %v512_v4 = vld [vmem:[%s2618_s27 + $0x58] sm:$0xff]  ;;  %v513_v5 = vld [vmem:[%s2618_s27 + $0x60] sm:$0xff]  ;;  %s468_s20 = scalar_lea.vmem %s3628_s1, %s2172_s10  ;;  %v514_v6 = vld [vmem:[%s2618_s27 + $0x68] sm:$0xff]  ;;  %p475_p9 = scmp.lt.s32.totalorder %s2250_s19, 15 }
  0x19   : > { %2328 = vmatmul.mubr.msk.f32.vlgmr.msra.gmra.mxu1 %vm529_vm0, %v510_v2  ;;  %v501_v7 = vld [vmem:[%s2618_s27] sm:$0xff]  ;;  %v518_v9 = vld [vmem:[%s468_s20 + $0x8] sm:$0xff]  ;;  %v515_v10 = vld [vmem:[%s2618_s27 + $0x70] sm:$0xff]  ;;  %p775_p10 = scmp.eq.s32.totalorder %s2490_s30, 0  ;;  %s2514_s28 = smov 12  }
  0x1a   : > { %2330 = vmatprep.mubr.msk.f32.mxu1 %vm529_vm0, %v511_v3  ;;  %v517_v8 = vld [vmem:[%s468_s20] sm:$0xff]  ;;  %v502_v11 = vld [vmem:[%s2618_s27 + $0x8] sm:$0xff]  ;;  %v516_v12 = vld [vmem:[%s2618_s27 + $0x78] sm:$0xff]  ;;  %s3673_s19 = smov (!%p475_p9, %s2250_s19), 15  ;;  %s2509_s20 = smov 28  }
  0x1b   : > { %2312 = vmatprep.mubr.msk.f32.mxu0 %vm529_vm0, %v517_v8  ;;  %v503_v13 = vld [vmem:[%s2618_s27 + $0x10] sm:$0xff]  ;;  %v504_v14 = vld [vmem:[%s2618_s27 + $0x18] sm:$0xff]  ;;  %v505_v15 = vld [vmem:[%s2618_s27 + $0x20] sm:$0xff]  ;;  %s3675_s19 = smov (!%p475_p9, %s3673_s19), 15  ;;  %s2515_s29 = smov 20  }
  0x1c   : > { %2313 = vmatmul.mubr.msk.f32.vlgmr.msra.gmra.mxu0 %vm529_vm0, %v518_v9  ;;  %v506_v16 = vld [vmem:[%s2618_s27 + $0x28] sm:$0xff]  ;;  %v507_v17 = vld [vmem:[%s2618_s27 + $0x30] sm:$0xff]  ;;  %v508_v18 = vld [vmem:[%s2618_s27 + $0x38] sm:$0xff]  ;;  %s2177_s22 = sshll.u32 %s3675_s19, 1  ;;  %s2510_s19 = smov 4  }
  0x1d   : > { %2331 = vmatmul.mubr.msk.f32.gmra.mxu1 %vm529_vm0, %v512_v4  ;;  %2315 = vmatprep.mubr.msk.f32.mxu0 %vm529_vm0, %v501_v7  ;;  %s483_s25 = sadd.s32 %s2177_s22, %s2607_s21  ;;  %s3638_s21 = smov 16  }
  0x1e   : > { %2333 = vmatprep.mubr.msk.f32.mxu1 %vm529_vm0, %v513_v5  ;;  %s2179_s26 = sshll.u32 %s483_s25, 3  ;;  %s2511_s22 = smov 32  }
  0x1f   : > { %s485_s10 = scalar_lea.vmem %s3629_s2, %s2179_s26  ;;  %s2512_s25 = smov 8  }
  0x20   : > { %2316 = vmatmul.mubr.msk.f32.gmra.mxu0 %vm529_vm0, %v502_v11  ;;  %v519_v19 = vld [vmem:[%s485_s10] sm:$0xff]  ;;  %v520_v20 = vld [vmem:[%s485_s10 + $0x8] sm:$0xff]  ;;  %s776_s18 = scalar_select %p775_p10, 1, 0 }
  0x21   : > { %2334 = vmatmul.mubr.msk.f32.gmra.mxu1 %vm529_vm0, %v514_v6  ;;  %2318 = vmatprep.mubr.msk.f32.mxu0 %vm529_vm0, %v503_v13  ;;  %s2513_s26 = smov 24   ;;  %s3643_s24 = smov 16  }
  0x22   : > { %2336 = vmatprep.mubr.msk.f32.mxu1 %vm529_vm0, %v515_v10  ;;  %v777_v31 = vstv %s776_s18  ;;  %p799_p11 = scmp.eq.s32.totalorder %s2490_s30, 1 }
  0x23   : > { %vm778_vm1 = vcmp.eq.s32.totalorder %v777_v31, 1 }
  0x24   : > { %2319 = vmatmul.mubr.msk.f32.gmra.mxu0 %vm529_vm0, %v504_v14  ;;  %s800_s30 = scalar_select %p799_p11, 1, 0 }
  0x25   : > { %2337 = vmatmul.mubr.msk.f32.gmra.mxu1 %vm529_vm0, %v516_v12  ;;  %2321 = vmatprep.mubr.msk.f32.mxu0 %vm529_vm0, %v505_v15 }
  0x26   : > { %2339 = vmatprep.mubr.msk.f32.mxu1 %vm529_vm0, %v519_v19 }
  0x28   : > { %2322 = vmatmul.mubr.msk.f32.gmra.mxu0 %vm529_vm0, %v506_v16 }
  0x29   : > { %2324 = vmatprep.mubr.msk.f32.mxu0 %vm529_vm0, %v507_v17  ;;  %2340 = vmatmul.mubr.msk.f32.gmra.mxu1 %vm529_vm0, %v520_v20 }
  0x2c   : > { %2325 = vmatmul.mubr.msk.f32.gmra.mxu0 %vm529_vm0, %v508_v18 }
  0xd9   : > { %v2329_v22 = vpop.f32.mrf.mxu1 }
  0xda   : > { %v712_v23 = vadd.f32 %v2329_v22, %v2668_v21 }
  0xdb   : > { %v706_v24 = vpop.f32.mrf.mxu1 }
  0xdc   : > { %v2672_v25 = vmax.f32 %v712_v23, 0.0  ;;  %v707_v26 = vadd.f32 %v2668_v21, %v706_v24  ;;  %v2314_v30 = vpop.f32.mrf.mxu0 }
  0xdd   : > { %v2332_v27 = vpop.f32.mrf.mxu1  ;;  %v662_v33 = vadd.f32 %v2314_v30, %v2668_v21 }
  0xde   : > { %1164 = vrot.lane.b32.xlu1 %v2672_v25, %s3638_s21  ;;  %1310 = vrot.lane.b32.xlu0 %v2672_v25, %s2509_s20  ;;  %v2681_v29 = vmax.f32 %v707_v26, 0.0  ;;  %v722_v34 = vadd.f32 %v2332_v27, %v2668_v21  ;;  %v656_v36 = vpop.f32.mrf.mxu0  ;;  %v906_v48 = vrot.slane %v2672_v25, 1  ;;  %v843_v55 = vrot.slane %v2672_v25, 7 }
  0xdf   : > { %v2679_v28 = vpop.f32.mrf.mxu1  ;;  %v756_v37 = vmax.f32 %v662_v33, 0.0  ;;  %v657_v38 = vadd.f32 %v2668_v21, %v656_v36 }
  0xe0   : > { %v2694_v41 = vmax.f32 %v722_v34, 0.0  ;;  %v896_v45 = vrot.slane %v2681_v29, 1  ;;  %v833_v53 = vrot.slane %v2681_v29, 7  ;;  %v717_v4 = vadd.f32 %v2668_v21, %v2679_v28  ;;  %v2317_v8 = vpop.f32.mrf.mxu0 }
  0xe1   : > { %v2683_v32 = vpop.f32.mrf.mxu1  ;;  %v755_v40 = vmax.f32 %v657_v38, 0.0  ;;  %v2702_v44 = vsel %vm778_vm1, 0.0, %v756_v37  ;;  %v672_v13 = vadd.f32 %v2317_v8, %v2668_v21 }
  0xe2   : > { %990 = vrot.lane.b32.xlu0 %v2672_v25, %s2510_s19  ;;  %1308 = vrot.lane.b32.xlu1 %v2681_v29, %s2509_s20  ;;  %v838_v49 = vrot.slane %v2702_v44, 7  ;;  %v917_v50 = vsel %vm911_vm2, %v896_v45, %v906_v48  ;;  %v864_v58 = vsel %vm848_vm3, %v843_v55, %v833_v53  ;;  %v2749_v62 = vsel %vm848_vm3, %v833_v53, %v843_v55  ;;  %v666_v10 = vpop.f32.mrf.mxu0 }
  0xe3   : > { %v2692_v39 = vpop.f32.mrf.mxu1  ;;  %v2710_v46 = vsel %vm778_vm1, 0.0, %v755_v40  ;;  %v2745_v61 = vsel %vm826_vm4, 0.0, %v864_v58  ;;  %v927_v3 = vsel %vm911_vm2, %v906_v48, %v896_v45  ;;  %v767_v6 = vmax.f32 %v717_v4, 0.0 }
  0xe4   : > { %v828_v51 = vrot.slane %v2710_v46, 7  ;;  %v943_v5 = vsel %vm890_vm5, 0.0, %v927_v3  ;;  %v732_v7 = vadd.f32 %v2683_v32, %v2668_v21  ;;  %v901_v11 = vrot.slane %v2702_v44, 1  ;;  %v2320_v32 = vpop.f32.mrf.mxu0 }
  0xe5   : > { %v2338_v43 = vpop.f32.mrf.mxu1  ;;  %v891_v12 = vrot.slane %v2710_v46, 1  ;;  %v667_v14 = vadd.f32 %v2668_v21, %v666_v10  ;;  %v2799_v16 = vmax.f32 %v672_v13, 0.0  ;;  %v897_v18 = vrot.slane %v767_v6, 1 }
  0xe6   : > { %988 = vrot.lane.b32.xlu0 %v2681_v29, %s2510_s19  ;;  %1162 = vrot.lane.b32.xlu1 %v2681_v29, %s3638_s21  ;;  %v742_v54 = vadd.f32 %v2338_v43, %v2668_v21  ;;  %v2729_v57 = vsel %vm848_vm3, %v828_v51, %v838_v49  ;;  %v2741_v60 = vsel %vm848_vm3, %v838_v49, %v828_v51  ;;  %v2786_v9 = vmax.f32 %v732_v7, 0.0 }
  0xe7   : > { %v736_v47 = vpop.f32.mrf.mxu1  ;;  %v912_v15 = vsel %vm911_vm2, %v891_v12, %v901_v11  ;;  %v2801_v17 = vmax.f32 %v667_v14, 0.0  ;;  %v907_v19 = vrot.slane %v2694_v41, 1  ;;  %v922_v22 = vsel %vm911_vm2, %v901_v11, %v891_v12 }
  0xe8   : > { %v737_v52 = vadd.f32 %v2668_v21, %v736_v47  ;;  %v2737_v59 = vmax.f32 %v742_v54, 0.0  ;;  %v834_v23 = vrot.slane %v767_v6, 7  ;;  %v844_v24 = vrot.slane %v2694_v41, 7 }
  0xe9   : > { %v918_v20 = vsel %vm911_vm2, %v897_v18, %v907_v19  ;;  %v933_v25 = vsel %vm890_vm5, 0.0, %v922_v22  ;;  %v928_v29 = vsel %vm911_vm2, %v907_v19, %v897_v18  ;;  %v727_v30 = vadd.f32 %v2668_v21, %v2692_v39 }
  0xea   : > { %970 = vrot.lane.b32.xlu0 %v2702_v44, %s2510_s19  ;;  %1168 = vrot.lane.b32.xlu1 %v2694_v41, %s3638_s21  ;;  %v2725_v56 = vmax.f32 %v737_v52, 0.0  ;;  %v909_v1 = vrot.slane %v2737_v59, 1  ;;  %v865_v26 = vsel %vm848_vm3, %v844_v24, %v834_v23  ;;  %v2838_v28 = vsel %vm848_vm3, %v834_v23, %v844_v24 }
  0xeb   : > { %v2830_v27 = vsel %vm826_vm4, 0.0, %v865_v26  ;;  %v945_v31 = vsel %vm890_vm5, 0.0, %v928_v29  ;;  %v769_v33 = vmax.f32 %v727_v30, 0.0  ;;  %v682_v34 = vadd.f32 %v2320_v32, %v2668_v21  ;;  %v1532_v29 = vld [vmem:[%s3632_s5 + $0x18] sm:$0xff]  ;;  %v1531_v30 = vld [vmem:[%s3632_s5 + $0x10] sm:$0xff] }
  0xec   : > { %v899_v63 = vrot.slane %v2725_v56, 1  ;;  %v829_v36 = vrot.slane %v2801_v17, 7  ;;  %v839_v37 = vrot.slane %v2799_v16, 7  ;;  %v892_v39 = vrot.slane %v2801_v17, 1 }
  0xed   : > { %v2856_v35 = vmax.f32 %v682_v34, 0.0  ;;  %v902_v40 = vrot.slane %v2799_v16, 1  ;;  %v898_v48 = vrot.slane %v769_v33, 1  ;;  %v908_v49 = vrot.slane %v2786_v9, 1  ;;  %v1530_v34 = vld [vmem:[%s3632_s5 + $0x8] sm:$0xff] }
  0xee   : > { %1314 = vrot.lane.b32.xlu0 %v2694_v41, %s2509_s20  ;;  %1358 = vrot.lane.b32.xlu1 %v917_v50, %s2511_s22  ;;  %v2766_v2 = vsel %vm911_vm2, %v909_v1, %v899_v63  ;;  %v2867_v38 = vsel %vm848_vm3, %v829_v36, %v839_v37  ;;  %v835_v53 = vrot.slane %v769_v33, 7  ;;  %v845_v54 = vrot.slane %v2786_v9, 7 }
  0xef   : > { %v913_v43 = vsel %vm911_vm2, %v892_v39, %v902_v40  ;;  %v919_v52 = vsel %vm911_vm2, %v898_v48, %v908_v49  ;;  %v929_v10 = vsel %vm911_vm2, %v908_v49, %v898_v48  ;;  %v903_v26 = vrot.slane %v2856_v35, 1 }
  0xf0   : > { %v866_v3 = vsel %vm848_vm3, %v845_v54, %v835_v53  ;;  %v947_v13 = vsel %vm890_vm5, 0.0, %v929_v10 }
  0xf2   : > { %994 = vrot.lane.b32.xlu0 %v2694_v41, %s2510_s19  ;;  %1052 = vrot.lane.b32.xlu1 %v917_v50, %s2512_s25  ;;  %v676_v41 = vpop.f32.mrf.mxu0 }
  0xf3   : > { %v677_v44 = vadd.f32 %v2668_v21, %v676_v41  ;;  %v1529_v41 = vld [vmem:[%s3632_s5] sm:$0xff] }
  0xf4   : > { %v2323_v14 = vpop.f32.mrf.mxu0 }
  0xf5   : > { %v2883_v45 = vmax.f32 %v677_v44, 0.0 }
  0xf6   : > { %1258 = vrot.lane.b32.xlu1 %v2745_v61, %s2513_s26  ;;  %1260 = vrot.lane.b32.xlu0 %v2749_v62, %s2513_s26 }
  0xfa   : > { %1112 = vrot.lane.b32.xlu1 %v2745_v61, %s2514_s28  ;;  %1114 = vrot.lane.b32.xlu0 %v2749_v62, %s2514_s28 }
  0xfe   : > { %1360 = vrot.lane.b32.xlu1 %v943_v5, %s2511_s22  ;;  %1212 = vrot.lane.b32.xlu0 %v917_v50, %s2515_s29  ;;  %v923_v50 = vsel %vm911_vm2, %v902_v40, %v892_v39 }
  0xff   : > { %v935_v51 = vsel %vm890_vm5, 0.0, %v923_v50  ;;  %v686_v50 = vpop.f32.mrf.mxu0 }
 0x102   : > { %1312 = vrot.lane.b32.xlu1 %v767_v6, %s2509_s20  ;;  %968 = vrot.lane.b32.xlu0 %v2710_v46, %s2510_s19  ;;  %v860_v46 = vsel %vm848_vm3, %v839_v37, %v829_v36  ;;  %v830_v36 = vrot.slane %v2883_v45, 7  ;;  %v840_v37 = vrot.slane %v2856_v35, 7 }
 0x103   : > { %v2893_v47 = vsel %vm826_vm4, 0.0, %v860_v46 }
 0x106   : > { %1166 = vrot.lane.b32.xlu1 %v767_v6, %s3638_s21  ;;  %1214 = vrot.lane.b32.xlu0 %v943_v5, %s2515_s29 }
 0x10a   : > { %1172 = vrot.lane.b32.xlu1 %v2786_v9, %s3638_s21  ;;  %1054 = vrot.lane.b32.xlu0 %v943_v5, %s2512_s25 }
 0x10e   : > { %1032 = vrot.lane.b32.xlu1 %v912_v15, %s2512_s25  ;;  %992 = vrot.lane.b32.xlu0 %v767_v6, %s2510_s19  ;;  %v2923_v6 = vsel %vm826_vm4, 0.0, %v866_v3 }
 0x112   : > { %1148 = vrot.lane.b32.xlu0 %v2799_v16, %s3638_s21  ;;  %972 = vrot.lane.b32.xlu1 %v2801_v17, %s2510_s19 }
 0x116   : > { %974 = vrot.lane.b32.xlu0 %v2799_v16, %s2510_s19  ;;  %1362 = vrot.lane.b32.xlu1 %v918_v20, %s2511_s22 }
 0x11a   : > { %1318 = vrot.lane.b32.xlu0 %v2786_v9, %s2509_s20  ;;  %1056 = vrot.lane.b32.xlu1 %v918_v20, %s2512_s25 }
 0x11e   : > { %998 = vrot.lane.b32.xlu0 %v2786_v9, %s2510_s19  ;;  %1034 = vrot.lane.b32.xlu1 %v933_v25, %s2512_s25  ;;  %v2935_v9 = vsel %vm848_vm3, %v835_v53, %v845_v54  ;;  %v893_v25 = vrot.slane %v2883_v45, 1 }
 0x122   : > { %1262 = vrot.lane.b32.xlu1 %v2830_v27, %s2513_s26  ;;  %1146 = vrot.lane.b32.xlu0 %v2801_v17, %s3638_s21  ;;  %v692_v17 = vadd.f32 %v2323_v14, %v2668_v21 }
 0x124   : > { %v2967_v22 = vmax.f32 %v692_v17, 0.0 }
 0x126   : > { %1116 = vrot.lane.b32.xlu1 %v2830_v27, %s2514_s28  ;;  %1264 = vrot.lane.b32.xlu0 %v2838_v28, %s2513_s26 }
 0x12a   : > { %1364 = vrot.lane.b32.xlu1 %v945_v31, %s2511_s22  ;;  %1118 = vrot.lane.b32.xlu0 %v2838_v28, %s2514_s28 }
 0x12e   : > { %1316 = vrot.lane.b32.xlu1 %v769_v33, %s2509_s20  ;;  %1216 = vrot.lane.b32.xlu0 %v918_v20, %s2515_s29  ;;  %v1533_v20 = vld [vmem:[%s3632_s5 + $0x20] sm:$0xf] }
 0x12f   : > { %2342 = vmatprep.subr.msk.mxu1 %vm1590_vm6, %v1533_v20 }
 0x130   : > { %2343 = vmatpush3.msk.msra.mxu1 %vm1590_vm6, %v1533_v20 }
 0x131   : > { %2344 = vmatprep.subr.mxu1 %v1532_v29 }
 0x132   : > { %1170 = vrot.lane.b32.xlu1 %v769_v33, %s3638_s21  ;;  %1218 = vrot.lane.b32.xlu0 %v945_v31, %s2515_s29 }
 0x133   : > { %2345 = vmatpush3.msra.mxu1 %v1532_v29 }
 0x134   : > { %2346 = vmatprep.subr.mxu1 %v1531_v30 }
 0x135   : > { %2347 = vmatpush3.msra.mxu1 %v1531_v30 }
 0x136   : > { %1152 = vrot.lane.b32.xlu1 %v2856_v35, %s3638_s21  ;;  %1058 = vrot.lane.b32.xlu0 %v945_v31, %s2512_s25 }
 0x137   : > { %2348 = vmatprep.subr.mxu1 %v1530_v34 }
 0x138   : > { %2349 = vmatpush3.msra.mxu1 %v1530_v34 }
 0x139   : > { %2350 = vmatprep.subr.mxu1 %v1529_v41 }
 0x13a   : > { %996 = vrot.lane.b32.xlu0 %v769_v33, %s2510_s19  ;;  %1098 = vrot.lane.b32.xlu1 %v2867_v38, %s2514_s28  ;;  %v914_v33 = vsel %vm911_vm2, %v893_v25, %v903_v26 }
 0x13b   : > { %2351 = vmatpush3.msra.mxu1 %v1529_v41 }
 0x13e   : > { %1298 = vrot.lane.b32.xlu0 %v2856_v35, %s2509_s20  ;;  %1196 = vrot.lane.b32.xlu1 %v913_v43, %s2515_s29 }
 0x142   : > { %978 = vrot.lane.b32.xlu0 %v2856_v35, %s2510_s19  ;;  %1036 = vrot.lane.b32.xlu1 %v913_v43, %s2512_s25  ;;  %v861_v43 = vsel %vm848_vm3, %v840_v37, %v830_v36 }
 0x143   : > { %v3025_v46 = vsel %vm826_vm4, 0.0, %v861_v43 }
 0x146   : > { %1322 = vrot.lane.b32.xlu0 %v2737_v59, %s2509_s20  ;;  %1296 = vrot.lane.b32.xlu1 %v2883_v45, %s2509_s20 }
 0x14a   : > { %1096 = vrot.lane.b32.xlu0 %v2893_v47, %s2514_s28  ;;  %1150 = vrot.lane.b32.xlu1 %v2883_v45, %s3638_s21 }
 0x14e   : > { %1198 = vrot.lane.b32.xlu0 %v935_v51, %s2515_s29  ;;  %1366 = vrot.lane.b32.xlu1 %v919_v52, %s2511_s22 }
 0x150   : > { %v2909_v55 = vpop.permute.xlu1 %1164  ;;  %v2911_v58 = vpop.permute.xlu0 %1310 }
 0x152   : > { %1038 = vrot.lane.b32.xlu0 %v935_v51, %s2512_s25  ;;  %1060 = vrot.lane.b32.xlu1 %v919_v52, %s2512_s25  ;;  %v924_v51 = vsel %vm911_vm2, %v903_v26, %v893_v25  ;;  %v836_v25 = vrot.slane %v2725_v56, 7  ;;  %v846_v26 = vrot.slane %v2737_v59, 7 }
 0x153   : > { %v937_v3 = vsel %vm890_vm5, 0.0, %v924_v51 }
 0x154   : > { %v2917_v4 = vpop.permute.xlu0 %990  ;;  %v2919_v5 = vpop.permute.xlu1 %1308  ;;  %v867_v34 = vsel %vm848_vm3, %v846_v26, %v836_v25 }
 0x156   : > { %976 = vrot.lane.b32.xlu0 %v2883_v45, %s2510_s19  ;;  %1266 = vrot.lane.b32.xlu1 %v2923_v6, %s2513_s26  ;;  %v3021_v45 = vsel %vm848_vm3, %v830_v36, %v840_v37 }
 0x158   : > { %v2929_v7 = vpop.permute.xlu0 %988  ;;  %v2931_v8 = vpop.permute.xlu1 %1162 }
 0x15a   : > { %1268 = vrot.lane.b32.xlu0 %v2935_v9, %s2513_s26  ;;  %1120 = vrot.lane.b32.xlu1 %v2923_v6, %s2514_s28 }
 0x15c   : > { %v2943_v11 = vpop.permute.xlu0 %970  ;;  %v2945_v12 = vpop.permute.xlu1 %1168 }
 0x15d   : > { %v1396_v43 = vsel %vm1394_vm7, %v2729_v57, %v2943_v11  ;;  %v904_v11 = vrot.slane %v2967_v22, 1 }
 0x15e   : > { %1122 = vrot.lane.b32.xlu0 %v2935_v9, %s2514_s28  ;;  %1368 = vrot.lane.b32.xlu1 %v947_v13, %s2511_s22 }
 0x160   : > { %v2952_v15 = vpop.permute.xlu0 %1314  ;;  %v2954_v16 = vpop.permute.xlu1 %1358 }
 0x161   : > { %3640 = vst [vmem:[#allocation2_spill] sm:$0xff] %v2952_v15 }
 0x162   : > { %1220 = vrot.lane.b32.xlu0 %v919_v52, %s2515_s29  ;;  %1320 = vrot.lane.b32.xlu1 %v2725_v56, %s2509_s20  ;;  %v687_v52 = vadd.f32 %v2668_v21, %v686_v50 }
 0x164   : > { %v2960_v18 = vpop.permute.xlu0 %994  ;;  %v2962_v19 = vpop.permute.xlu1 %1052  ;;  %v3050_v10 = vmax.f32 %v687_v52, 0.0 }
 0x166   : > { %1222 = vrot.lane.b32.xlu0 %v947_v13, %s2515_s29  ;;  %1174 = vrot.lane.b32.xlu1 %v2725_v56, %s3638_s21  ;;  %v857_v56 = vsel %vm848_vm3, %v836_v25, %v846_v26  ;;  %v894_v57 = vrot.slane %v3050_v10, 1 }
 0x168   : > { %v2973_v23 = vpop.permute.xlu1 %1258  ;;  %v2975_v24 = vpop.permute.xlu0 %1260 }
 0x16a   : > { %1062 = vrot.lane.b32.xlu0 %v947_v13, %s2512_s25  ;;  %1156 = vrot.lane.b32.xlu1 %v2967_v22, %s3638_s21 }
 0x16c   : > { %v2989_v31 = vpop.permute.xlu1 %1112  ;;  %v2991_v32 = vpop.permute.xlu0 %1114 }
 0x16e   : > { %1302 = vrot.lane.b32.xlu0 %v2967_v22, %s2509_s20  ;;  %1346 = vrot.lane.b32.xlu1 %v914_v33, %s2511_s22 }
 0x170   : > { %v3003_v39 = vpop.permute.xlu1 %1360  ;;  %v3005_v40 = vpop.permute.xlu0 %1212 }
 0x171   : > { %3641 = vst [vmem:[#allocation3_spill] sm:$0xff] %v3003_v39 }
 0x172   : > { %982 = vrot.lane.b32.xlu0 %v2967_v22, %s2510_s19  ;;  %1040 = vrot.lane.b32.xlu1 %v914_v33, %s2512_s25 }
 0x174   : > { %v3015_v35 = vpop.permute.xlu1 %1312  ;;  %v3017_v44 = vpop.permute.xlu0 %968 }
 0x176   : > { %1248 = vrot.lane.b32.xlu0 %v3021_v45, %s2513_s26  ;;  %1246 = vrot.lane.b32.xlu1 %v3025_v46, %s2513_s26 }
 0x178   : > { %v3031_v48 = vpop.permute.xlu1 %1166  ;;  %v3033_v49 = vpop.permute.xlu0 %1214 }
 0x179   : > { %3642 = vst [vmem:[#allocation4_spill] sm:$0xff] %v3033_v49 }
 0x17a   : > { %1102 = vrot.lane.b32.xlu0 %v3021_v45, %s2514_s28  ;;  %1100 = vrot.lane.b32.xlu1 %v3025_v46, %s2514_s28 }
 0x17c   : > { %v3042_v53 = vpop.permute.xlu1 %1172  ;;  %v3044_v54 = vpop.permute.xlu0 %1054 }
 0x17e   : > { %1200 = vrot.lane.b32.xlu0 %v914_v33, %s2515_s29  ;;  %1348 = vrot.lane.b32.xlu1 %v937_v3, %s2511_s22  ;;  %v3078_v33 = vsel %vm911_vm2, %v899_v63, %v909_v1  ;;  %v885_v63 = vsel %vm826_vm4, 0.0, %v867_v34  ;;  %v2326_v1 = vpop.f32.mrf.mxu0 }
 0x17f   : > { %v702_v41 = vadd.f32 %v2326_v1, %v2668_v21 }
 0x180   : > { %v3052_v13 = vpop.permute.xlu1 %1032  ;;  %v3054_v14 = vpop.permute.xlu0 %992 }
 0x181   : > { %v3107_v25 = vmax.f32 %v702_v41, 0.0  ;;  %v841_v41 = vrot.slane %v2967_v22, 7 }
 0x182   : > { %1202 = vrot.lane.b32.xlu0 %v937_v3, %s2515_s29  ;;  %1300 = vrot.lane.b32.xlu1 %v3050_v10, %s2509_s20 }
 0x184   : > { %v3059_v17 = vpop.permute.xlu0 %1148  ;;  %v3061_v20 = vpop.permute.xlu1 %972 }
 0x186   : > { %1042 = vrot.lane.b32.xlu0 %v937_v3, %s2512_s25  ;;  %1154 = vrot.lane.b32.xlu1 %v3050_v10, %s3643_s24 }
 0x188   : > { %v3068_v29 = vpop.permute.xlu0 %974  ;;  %v3070_v30 = vpop.permute.xlu1 %1362 }
 0x189   : > { %3644 = vst [vmem:[#allocation5_spill] sm:$0xff] %v3070_v30 }
 0x18a   : > { %980 = vrot.lane.b32.xlu0 %v3050_v10, %s2510_s19  ;;  %1370 = vrot.lane.b32.xlu1 %v3078_v33, %s2511_s22 }
 0x18c   : > { %v3086_v36 = vpop.permute.xlu0 %1318  ;;  %v3088_v37 = vpop.permute.xlu1 %1056 }
 0x18e   : > { %1272 = vrot.lane.b32.xlu0 %v857_v56, %s2513_s26  ;;  %1270 = vrot.lane.b32.xlu1 %v885_v63, %s2513_s26 }
 0x190   : > { %v999_v50 = vpop.permute.xlu0 %998  ;;  %v1035_v51 = vpop.permute.xlu1 %1034 }
 0x191   : > { %v3102_v52 = vsel %vm1394_vm7, %v2935_v9, %v999_v50  ;;  %v3105_v3 = vsel %vm529_vm0, %v1396_v43, %v1035_v51  ;;  %v1405_v43 = vsel %vm1394_vm7, %v2745_v61, %v2929_v7  ;;  %v1406_v7 = vsel %vm1394_vm7, %v2749_v62, %v2917_v4 }
 0x192   : > { %1126 = vrot.lane.b32.xlu0 %v857_v56, %s2514_s28  ;;  %1124 = vrot.lane.b32.xlu1 %v885_v63, %s2514_s28  ;;  %v915_v56 = vsel %vm911_vm2, %v894_v57, %v904_v11  ;;  %v831_v63 = vrot.slane %v3050_v10, 7  ;;  %v1421_v50 = vsel %vm529_vm0, %v1405_v43, %v2962_v19  ;;  %v1422_v19 = vsel %vm529_vm0, %v1406_v7, %v3044_v54 }
 0x194   : > { %v3111_v26 = vpop.permute.xlu1 %1262  ;;  %v3113_v34 = vpop.permute.xlu0 %1146  ;;  %v3140_v22 = vsel %vm848_vm3, %v831_v63, %v841_v41  ;;  %v862_v61 = vsel %vm848_vm3, %v841_v41, %v831_v63  ;;  %v925_v41 = vsel %vm911_vm2, %v904_v11, %v894_v57 }
 0x195   : > { %v3162_v63 = vsel %vm826_vm4, 0.0, %v862_v61 }
 0x196   : > { %1306 = vrot.lane.b32.xlu0 %v3107_v25, %s2509_s20  ;;  %1160 = vrot.lane.b32.xlu1 %v3107_v25, %s3643_s24 }
 0x198   : > { %v1117_v9 = vpop.permute.xlu1 %1116  ;;  %v3121_v1 = vpop.permute.xlu0 %1264 }
 0x199   : > { %3645 = vst [vmem:[#allocation6_spill] sm:$0xff] %v3121_v1  ;;  %v1438_v10 = vsel %vm1427_vm8, %v1421_v50, %v1117_v9 }
 0x19a   : > { %986 = vrot.lane.b32.xlu0 %v3107_v25, %s2510_s19  ;;  %1350 = vrot.lane.b32.xlu1 %v915_v56, %s2511_s22  ;;  %v1455_v43 = vsel %vm1444_vm9, %v1438_v10, %v3031_v48  ;;  %v1408_v10 = vsel %vm1394_vm7, %v2838_v28, %v2960_v18 }
 0x19c   : > { %v3135_v51 = vpop.permute.xlu1 %1364  ;;  %v1119_v15 = vpop.permute.xlu0 %1118 }
 0x19d   : > { %3646 = vst [vmem:[#allocation7_spill] sm:$0xff] %v3135_v51  ;;  %v1439_v51 = vsel %vm1427_vm8, %v1422_v19, %v1119_v15  ;;  %v696_v15 = vpop.f32.mrf.mxu0 }
 0x19e   : > { %1252 = vrot.lane.b32.xlu0 %v3140_v22, %s2513_s26  ;;  %1044 = vrot.lane.b32.xlu1 %v915_v56, %s2512_s25  ;;  %v1456_v4 = vsel %vm1444_vm9, %v1439_v51, %v2945_v12  ;;  %v697_v61 = vadd.f32 %v2668_v21, %v696_v15  ;;  %v1397_v15 = vsel %vm1394_vm7, %v2893_v47, %v3061_v20  ;;  %v2341_v47 = vpop.f32.mrf.mxu1 }
 0x1a0   : > { %v3152_v9 = vpop.permute.xlu1 %1316  ;;  %v1217_v50 = vpop.permute.xlu0 %1216  ;;  %v763_v57 = vmax.f32 %v697_v61, 0.0 }
 0x1a1   : > { %v3158_v30 = vsel %vm1461_vm10, %v1455_v43, %v1217_v50  ;;  %v842_v50 = vrot.slane %v3107_v25, 7 }
 0x1a2   : > { %1106 = vrot.lane.b32.xlu0 %v3140_v22, %s2514_s28  ;;  %1250 = vrot.lane.b32.xlu1 %v3162_v63, %s2513_s26  ;;  %v832_v43 = vrot.slane %v763_v57, 7 }
 0x1a4   : > { %v3168_v62 = vpop.permute.xlu1 %1170  ;;  %v1219_v48 = vpop.permute.xlu0 %1218 }
 0x1a5   : > { %v3173_v54 = vsel %vm1461_vm10, %v1456_v4, %v1219_v48  ;;  %v895_v4 = vrot.slane %v763_v57, 1  ;;  %v905_v48 = vrot.slane %v3107_v25, 1  ;;  %v3217_v25 = vsel %vm848_vm3, %v832_v43, %v842_v50 }
 0x1a6   : > { %1204 = vrot.lane.b32.xlu0 %v915_v56, %s2515_s29  ;;  %1104 = vrot.lane.b32.xlu1 %v3162_v63, %s2514_s28  ;;  %v939_v56 = vsel %vm890_vm5, 0.0, %v925_v41 }
 0x1a8   : > { %v3184_v12 = vpop.permute.xlu1 %1152  ;;  %v1059_v51 = vpop.permute.xlu0 %1058 }
 0x1a9   : > { %v3187_v7 = vsel %vm529_vm0, %v1408_v10, %v1059_v51 }
 0x1aa   : > { %1206 = vrot.lane.b32.xlu0 %v939_v56, %s2515_s29  ;;  %1352 = vrot.lane.b32.xlu1 %v939_v56, %s2511_s22 }
 0x1ac   : > { %v997_v11 = vpop.permute.xlu0 %996  ;;  %v3193_v19 = vpop.permute.xlu1 %1098 }
 0x1ae   : > { %1046 = vrot.lane.b32.xlu0 %v939_v56, %s2512_s25  ;;  %1304 = vrot.lane.b32.xlu1 %v763_v57, %s2509_s20  ;;  %v916_v56 = vsel %vm911_vm2, %v895_v4, %v905_v48 }
 0x1b0   : > { %v3197_v28 = vpop.permute.xlu0 %1298  ;;  %v3199_v18 = vpop.permute.xlu1 %1196 }
 0x1b2   : > { %984 = vrot.lane.b32.xlu0 %v763_v57, %s2510_s19  ;;  %1158 = vrot.lane.b32.xlu1 %v763_v57, %s3643_s24  ;;  %v869_v57 = vsel %vm826_vm4, 0.0, %v2741_v60 }
 0x1b4   : > { %v979_v41 = vpop.permute.xlu0 %978  ;;  %v1037_v10 = vpop.permute.xlu1 %1036 }
 0x1b5   : > { %v3210_v61 = vsel %vm1394_vm7, %v3021_v45, %v979_v41  ;;  %v3213_v51 = vsel %vm529_vm0, %v1397_v15, %v1037_v10  ;;  %v863_v15 = vsel %vm848_vm3, %v842_v50, %v832_v43  ;;  %v1395_v41 = vsel %vm1394_vm7, %v869_v57, %v3017_v44  ;;  %v746_v10 = vpop.f32.mrf.mxu1 }
 0x1b6   : > { %1256 = vrot.lane.b32.xlu0 %v3217_v25, %s2513_s26  ;;  %1354 = vrot.lane.b32.xlu1 %v916_v56, %s2511_s22  ;;  %v3246_v49 = vsel %vm826_vm4, 0.0, %v863_v15  ;;  %v926_v44 = vsel %vm911_vm2, %v905_v48, %v895_v4  ;;  %v1409_v4 = vsel %vm1394_vm7, %v2923_v6, %v997_v11 }
 0x1b7   : > { %v941_v57 = vsel %vm890_vm5, 0.0, %v926_v44 }
 0x1b8   : > { %v3224_v20 = vpop.permute.xlu0 %1322  ;;  %v3226_v45 = vpop.permute.xlu1 %1296 }
 0x1b9   : > { %3647 = vst [vmem:[#allocation8_spill] sm:$0xff] %v3224_v20  ;;  %v1411_v20 = vsel %vm529_vm0, %v1395_v41, %v3052_v13  ;;  %v752_v13 = vadd.f32 %v2341_v47, %v2668_v21 }
 0x1ba   : > { %1110 = vrot.lane.b32.xlu0 %v3217_v25, %s2514_s28  ;;  %1048 = vrot.lane.b32.xlu1 %v916_v56, %s2512_s25 }
 0x1bc   : > { %v1097_v1 = vpop.permute.xlu0 %1096  ;;  %v3241_v39 = vpop.permute.xlu1 %1150 }
 0x1bd   : > { %v1428_v60 = vsel %vm1427_vm8, %v1411_v20, %v1097_v1  ;;  %v747_v1 = vadd.f32 %v2668_v21, %v746_v10 }
 0x1be   : > { %v3250_v43 = vsel %vm1444_vm9, %v1428_v60, %v3113_v34  ;;  %1208 = vrot.lane.b32.xlu0 %v916_v56, %s2515_s29  ;;  %1254 = vrot.lane.b32.xlu1 %v3246_v49, %s2513_s26  ;;  %v801_v34 = vstv %s800_s30  ;;  %v774_v56 = vmax.f32 %v752_v13, 0.0 }
 0x1bf   : > { %v773_v15 = vmax.f32 %v747_v1, 0.0  ;;  %vm802_vm11 = vcmp.eq.s32.totalorder %v801_v34, 1 }
 0x1c0   : > { %v3259_v50 = vpop.permute.xlu0 %1198  ;;  %v1367_v20 = vpop.permute.xlu1 %1366  ;;  %v822_v41 = vsel %vm802_vm11, 0.0, %v774_v56 }
 0x1c1   : > { %v821_v10 = vsel %vm802_vm11, 0.0, %v773_v15  ;;  %v847_v11 = vrot.slane %v822_v41, 7 }
 0x1c2   : > { %1210 = vrot.lane.b32.xlu0 %v941_v57, %s2515_s29  ;;  %1108 = vrot.lane.b32.xlu1 %v3246_v49, %s2514_s28  ;;  %v837_v13 = vrot.slane %v821_v10, 7  ;;  %s3655_s28 = sshll.u32 %s2610_s23, 3 }
 0x1c3   : > { %s3548_s16 = scalar_lea.vmem %s3636_s9, %s3655_s28 }
 0x1c4   : > { %v3268_v48 = vpop.permute.xlu0 %1038  ;;  %v1061_v21 = vpop.permute.xlu1 %1060 }
 0x1c5   : > { %v3271_v47 = vsel %vm529_vm0, %v1409_v4, %v1061_v21 }
 0x1c6   : > { %1050 = vrot.lane.b32.xlu0 %v941_v57, %s2512_s25  ;;  %1356 = vrot.lane.b32.xlu1 %v941_v57, %s2511_s22  ;;  %v1407_v57 = vsel %vm1394_vm7, %v2830_v27, %v3054_v14  ;;  %v868_v14 = vsel %vm848_vm3, %v847_v11, %v837_v13 }
 0x1c7   : > { %v887_v21 = vsel %vm826_vm4, 0.0, %v868_v14 }
 0x1c8   : > { %v977_v60 = vpop.permute.xlu0 %976  ;;  %v1267_v44 = vpop.permute.xlu1 %1266 }
 0x1c9   : > { %v1489_v6 = vsel %vm1478_vm12, %v3158_v30, %v1267_v44  ;;  %v1423_v30 = vsel %vm529_vm0, %v1407_v57, %v3088_v37  ;;  %v910_v44 = vrot.slane %v822_v41, 1  ;;  %v1399_v42 = vsel %vm1394_vm7, %v3025_v46, %v977_v60 }
 0x1ca   : > { %v1506_v1 = vsel %vm1495_vm13, %v1489_v6, %v3152_v9  ;;  %1176 = vrot.lane.b32.xlu0 %v2737_v59, %s3643_s24  ;;  %1224 = vrot.lane.b32.xlu1 %v3078_v33, %s2515_s29  ;;  %v949_v33 = vsel %vm890_vm5, 0.0, %v2766_v2  ;;  %v900_v6 = vrot.slane %v821_v10, 1 }
 0x1cb   : > { %v3287_v34 = vsel %vm1512_vm14, %v1506_v1, %v1367_v20 }
 0x1cc   : > { %v1269_v56 = vpop.permute.xlu0 %1268  ;;  %v1121_v15 = vpop.permute.xlu1 %1120 }
 0x1cd   : > { %v1490_v9 = vsel %vm1478_vm12, %v3173_v54, %v1269_v56  ;;  %v1440_v59 = vsel %vm1427_vm8, %v1423_v30, %v1121_v15  ;;  %v921_v15 = vsel %vm911_vm2, %v900_v6, %v910_v44 }
 0x1ce   : > { %1372 = vrot.lane.b32.xlu0 %v949_v33, %s2511_s22  ;;  %1226 = vrot.lane.b32.xlu1 %v949_v33, %s2515_s29  ;;  %v1507_v27 = vsel %vm1495_vm13, %v1490_v9, %v3086_v36  ;;  %v1457_v37 = vsel %vm1444_vm9, %v1440_v59, %v3168_v62  ;;  %v858_v36 = vsel %vm848_vm3, %v837_v13, %v847_v11 }
 0x1d0   : > { %v1123_v54 = vpop.permute.xlu0 %1122  ;;  %v1369_v20 = vpop.permute.xlu1 %1368 }
 0x1d1   : > { %v1441_v4 = vsel %vm1427_vm8, %v3187_v7, %v1123_v54  ;;  %v3308_v2 = vsel %vm1512_vm14, %v1507_v27, %v1369_v20  ;;  %v931_v7 = vsel %vm911_vm2, %v910_v44, %v900_v6 }
 0x1d2   : > { %1274 = vrot.lane.b32.xlu0 %v887_v21, %s2513_s26  ;;  %1276 = vrot.lane.b32.xlu1 %v858_v36, %s2513_s26  ;;  %v1458_v11 = vsel %vm1444_vm9, %v1441_v4, %v3042_v53  ;;  %v951_v9 = vsel %vm890_vm5, 0.0, %v931_v7 }
 0x1d4   : > { %v1221_v62 = vpop.permute.xlu0 %1220  ;;  %v1321_v1 = vpop.permute.xlu1 %1320 }
 0x1d5   : > { %v1474_v57 = vsel %vm1461_vm10, %v1457_v37, %v1221_v62  ;;  %v1429_v37 = vsel %vm1427_vm8, %v3105_v3, %v3193_v19 }
 0x1d6   : > { %1324 = vrot.lane.b32.xlu0 %v821_v10, %s2509_s20  ;;  %1326 = vrot.lane.b32.xlu1 %v822_v41, %s2509_s20  ;;  %v1446_v60 = vsel %vm1444_vm9, %v1429_v37, %v3059_v17 }
 0x1d7   : > { %v1463_v3 = vsel %vm1461_vm10, %v1446_v60, %v3259_v50 }
 0x1d8   : > { %v1223_v13 = vpop.permute.xlu0 %1222  ;;  %v1175_v30 = vpop.permute.xlu1 %1174 }
 0x1d9   : > { %v1475_v56 = vsel %vm1461_vm10, %v1458_v11, %v1223_v13 }
 0x1da   : > { %1374 = vrot.lane.b32.xlu0 %v921_v15, %s2511_s22  ;;  %1376 = vrot.lane.b32.xlu1 %v951_v9, %s2511_s22 }
 0x1dc   : > { %v1063_v41 = vpop.permute.xlu0 %1062  ;;  %v3330_v10 = vpop.permute.xlu1 %1156 }
 0x1dd   : > { %v1426_v53 = vsel %vm529_vm0, %v3102_v52, %v1063_v41  ;;  %v1462_v52 = vsel %vm1461_vm10, %v3250_v43, %v3199_v18 }
 0x1e0   : > { %v3334_v59 = vpop.permute.xlu0 %1302  ;;  %v1347_v33 = vpop.permute.xlu1 %1346 }
 0x1e4   : > { %v3338_v27 = vpop.permute.xlu0 %982  ;;  %v1041_v0 = vpop.permute.xlu1 %1040 }
 0x1e5   : > { %v3341_v14 = vsel %vm529_vm0, %v1399_v42, %v1041_v0 }
 0x1e8   : > { %v1249_v54 = vpop.permute.xlu0 %1248  ;;  %v1247_v20 = vpop.permute.xlu1 %1246 }
 0x1e9   : > { %v1479_v4 = vsel %vm1478_vm12, %v1462_v52, %v1247_v20  ;;  %v1480_v18 = vsel %vm1478_vm12, %v1463_v3, %v1249_v54 }
 0x1ea   : > { %v1496_v46 = vsel %vm1495_vm13, %v1479_v4, %v3226_v45  ;;  %v1497_v17 = vsel %vm1495_vm13, %v1480_v18, %v3197_v28 }
 0x1eb   : > { %v1513_v21 = vsel %vm1512_vm14, %v1496_v46, %v1347_v33 }
 0x1ec   : > { %v1103_v19 = vpop.permute.xlu0 %1102  ;;  %2352 = vmatprep.mubr.msk.f32.mxu1 %vm1541_vm15, %v1513_v21  ;;  %v1101_v36 = vpop.permute.xlu1 %1100  ;;  %v1398_v21 = vsel %vm1394_vm7, %v2867_v38, %v3068_v29 }
 0x1ed   : > { %v1430_v43 = vsel %vm1427_vm8, %v3213_v51, %v1101_v36 }
 0x1ee   : > { %v1447_v45 = vsel %vm1444_vm9, %v1430_v43, %v3241_v39 }
 0x1f0   : > { %v1201_v44 = vpop.permute.xlu0 %1200  ;;  %v1349_v6 = vpop.permute.xlu1 %1348 }
 0x1f1   : > { %v1514_v62 = vsel %vm1512_vm14, %v1497_v17, %v1349_v6 }
 0x1f2   : > { %2353 = vmatmul.mubr.msk.f32.vlgmr.msra.gmra.mxu1 %vm1541_vm15, %v1514_v62 }
 0x1f4   : > { %v1203_v50 = vpop.permute.xlu0 %1202  ;;  %v1301_v7 = vpop.permute.xlu1 %1300 }
 0x1f8   : > { %v1043_v11 = vpop.permute.xlu0 %1042  ;;  %v1155_v13 = vpop.permute.xlu1 %1154 }
 0x1f9   : > { %v1416_v3 = vsel %vm529_vm0, %v3210_v61, %v1043_v11 }
 0x1fc   : > { %v3367_v15 = vpop.permute.xlu0 %980  ;;  %v1371_v9 = vpop.permute.xlu1 %1370 }
 0x200   : > { %v1273_v51 = vpop.permute.xlu0 %1272  ;;  %v1271_v41 = vpop.permute.xlu1 %1270 }
 0x201   : > { %v3370_v39 = vsel %vm1478_vm12, %v1475_v56, %v1273_v51  ;;  %v1491_v33 = vsel %vm1478_vm12, %v1474_v57, %v1271_v41 }
 0x202   : > { %v1508_v28 = vsel %vm1495_vm13, %v1491_v33, %v1321_v1 }
 0x203   : > { %v3375_v42 = vsel %vm1512_vm14, %v1508_v28, %v1371_v9 }
 0x204   : > { %v1127_v0 = vpop.permute.xlu0 %1126  ;;  %v1125_v37 = vpop.permute.xlu1 %1124 }
 0x205   : > { %v3378_v54 = vsel %vm1427_vm8, %v1426_v53, %v1127_v0  ;;  %v1442_v52 = vsel %vm1427_vm8, %v3271_v47, %v1125_v37  ;;  %v1414_v53 = vsel %vm529_vm0, %v1398_v21, %v3268_v48 }
 0x206   : > { %v3383_v20 = vsel %vm1444_vm9, %v1442_v52, %v1175_v30  ;;  %v1431_v47 = vsel %vm1427_vm8, %v1414_v53, %v1103_v19  ;;  %v1464_v30 = vsel %vm1461_vm10, %v1447_v45, %v1201_v44 }
 0x207   : > { %v1448_v29 = vsel %vm1444_vm9, %v1431_v47, %v3184_v12 }
 0x208   : > { %v3385_v56 = vpop.permute.xlu0 %1306  ;;  %v1161_v4 = vpop.permute.xlu1 %1160  ;;  %v1465_v19 = vsel %vm1461_vm10, %v1448_v29, %v1203_v50 }
 0x20c   : > { %v3387_v57 = vpop.permute.xlu0 %986  ;;  %v1351_v1 = vpop.permute.xlu1 %1350 }
 0x210   : > { %v1253_v46 = vpop.permute.xlu0 %1252  ;;  %v1045_v60 = vpop.permute.xlu1 %1044 }
 0x211   : > { %v1482_v44 = vsel %vm1478_vm12, %v1465_v19, %v1253_v46  ;;  %v1402_v46 = vsel %vm1394_vm7, %v3140_v22, %v3338_v27  ;;  %v1401_v22 = vsel %vm1394_vm7, %v3162_v63, %v3367_v15  ;;  %v1404_v19 = vsel %vm1394_vm7, %v3217_v25, %v3387_v57 }
 0x212   : > { %v1417_v27 = vsel %vm529_vm0, %v1401_v22, %v1045_v60 }
 0x214   : > { %v1107_v36 = vpop.permute.xlu0 %1106  ;;  %v1251_v18 = vpop.permute.xlu1 %1250 }
 0x215   : > { %v1433_v43 = vsel %vm1427_vm8, %v1416_v3, %v1107_v36  ;;  %v1481_v17 = vsel %vm1478_vm12, %v1464_v30, %v1251_v18 }
 0x216   : > { %v1498_v6 = vsel %vm1495_vm13, %v1481_v17, %v1301_v7  ;;  %v1450_v38 = vsel %vm1444_vm9, %v1433_v43, %v3330_v10  ;;  %v1499_v7 = vsel %vm1495_vm13, %v1482_v44, %v3334_v59 }
 0x217   : > { %v1515_v48 = vsel %vm1512_vm14, %v1498_v6, %v1351_v1 }
 0x218   : > { %v1205_v45 = vpop.permute.xlu0 %1204  ;;  %2355 = vmatprep.mubr.msk.f32.mxu1 %vm1541_vm15, %v1515_v48  ;;  %v1105_v61 = vpop.permute.xlu1 %1104 }
 0x219   : > { %v1432_v28 = vsel %vm1427_vm8, %v3341_v14, %v1105_v61 }
 0x21a   : > { %v1449_v59 = vsel %vm1444_vm9, %v1432_v28, %v1155_v13 }
 0x21b   : > { %v1466_v14 = vsel %vm1461_vm10, %v1449_v59, %v1205_v45 }
 0x21c   : > { %v1207_v62 = vpop.permute.xlu0 %1206  ;;  %v1353_v11 = vpop.permute.xlu1 %1352 }
 0x21d   : > { %v1516_v10 = vsel %vm1512_vm14, %v1499_v7, %v1353_v11  ;;  %v1467_v18 = vsel %vm1461_vm10, %v1450_v38, %v1207_v62  ;;  %v3648_v7 = vld [vmem:[#allocation4_spill] sm:$0xff] }
 0x21e   : > { %2356 = vmatmul.mubr.msk.f32.gmra.mxu1 %vm1541_vm15, %v1516_v10 }
 0x220   : > { %v1047_v12 = vpop.permute.xlu0 %1046  ;;  %v1305_v9 = vpop.permute.xlu1 %1304 }
 0x221   : > { %v1418_v53 = vsel %vm529_vm0, %v1402_v46, %v1047_v12 }
 0x224   : > { %v985_v51 = vpop.permute.xlu0 %984  ;;  %v1159_v41 = vpop.permute.xlu1 %1158 }
 0x225   : > { %v1403_v0 = vsel %vm1394_vm7, %v3246_v49, %v985_v51 }
 0x228   : > { %v1257_v50 = vpop.permute.xlu0 %1256  ;;  %v1355_v33 = vpop.permute.xlu1 %1354 }
 0x22c   : > { %v1111_v37 = vpop.permute.xlu0 %1110  ;;  %v1049_v52 = vpop.permute.xlu1 %1048 }
 0x22d   : > { %v1419_v1 = vsel %vm529_vm0, %v1403_v0, %v1049_v52  ;;  %v1435_v49 = vsel %vm1427_vm8, %v1418_v53, %v1111_v37  ;;  %v3653_v0 = vld [vmem:[#allocation7_spill] sm:$0xff] }
 0x22e   : > { %v1436_v21 = vsel %vm1427_vm8, %v1419_v1, %v2989_v31  ;;  %v1452_v17 = vsel %vm1444_vm9, %v1435_v49, %v1161_v4  ;;  %v1755_v4 = vld [vmem:[%s3634_s7] sm:$0xf]  ;;  %v3654_v1 = vld [vmem:[#allocation8_spill] sm:$0xff] }
 0x22f   : > { %v1453_v13 = vsel %vm1444_vm9, %v1436_v21, %v2931_v8  ;;  %v1484_v8 = vsel %vm1478_vm12, %v1467_v18, %v1257_v50  ;;  %2376 = vmatprep.subr.msk.mxu0 %vm1590_vm6, %v1755_v4  ;;  %v3652_v50 = vld [vmem:[#allocation2_spill] sm:$0xff]  ;;  %v1509_v46 = vsel %vm1495_vm13, %v3370_v39, %v3654_v1 }
 0x230   : > { %v1209_v47 = vpop.permute.xlu0 %1208  ;;  %v1255_v30 = vpop.permute.xlu1 %1254  ;;  %v1470_v29 = vsel %vm1461_vm10, %v1453_v13, %v3005_v40  ;;  %v1501_v45 = vsel %vm1495_vm13, %v1484_v8, %v3385_v56  ;;  %2377 = vmatpush3.msk.msra.mxu0 %vm1590_vm6, %v1755_v4 }
 0x231   : > { %v1483_v3 = vsel %vm1478_vm12, %v1466_v14, %v1255_v30 }
 0x232   : > { %v1500_v36 = vsel %vm1495_vm13, %v1483_v3, %v1305_v9  ;;  %v3649_v9 = vld [vmem:[#allocation3_spill] sm:$0xff] }
 0x233   : > { %v1517_v31 = vsel %vm1512_vm14, %v1500_v36, %v1355_v33 }
 0x234   : > { %v1211_v43 = vpop.permute.xlu0 %1210  ;;  %v1109_v6 = vpop.permute.xlu1 %1108  ;;  %2358 = vmatprep.mubr.msk.f32.mxu1 %vm1541_vm15, %v1517_v31 }
 0x235   : > { %v1469_v48 = vsel %vm1461_vm10, %v1452_v17, %v1211_v43  ;;  %v1434_v63 = vsel %vm1427_vm8, %v1417_v27, %v1109_v6 }
 0x236   : > { %v1451_v15 = vsel %vm1444_vm9, %v1434_v63, %v1159_v41  ;;  %v1486_v60 = vsel %vm1478_vm12, %v1469_v48, %v2975_v24  ;;  %v1487_v24 = vsel %vm1478_vm12, %v1470_v29, %v3111_v26 }
 0x237   : > { %v1468_v38 = vsel %vm1461_vm10, %v1451_v15, %v1209_v47  ;;  %v1503_v26 = vsel %vm1495_vm13, %v1486_v60, %v2911_v58  ;;  %v3651_v58 = vld [vmem:[#allocation5_spill] sm:$0xff] }
 0x238   : > { %v1051_v40 = vpop.permute.xlu0 %1050  ;;  %v1357_v61 = vpop.permute.xlu1 %1356  ;;  %v1485_v44 = vsel %vm1478_vm12, %v1468_v38, %v2973_v23  ;;  %v1520_v51 = vsel %vm1512_vm14, %v1503_v26, %v3649_v9 }
 0x239   : > { %v1420_v62 = vsel %vm529_vm0, %v1404_v19, %v1051_v40  ;;  %v1518_v11 = vsel %vm1512_vm14, %v1501_v45, %v1357_v61  ;;  %v1502_v25 = vsel %vm1495_vm13, %v1485_v44, %v2919_v5  ;;  %v1504_v5 = vsel %vm1495_vm13, %v1487_v24, %v3015_v35 }
 0x23a   : > { %v1437_v56 = vsel %vm1427_vm8, %v1420_v62, %v2991_v32  ;;  %2359 = vmatmul.mubr.msk.f32.gmra.mxu1 %vm1541_vm15, %v1518_v11  ;;  %v1519_v23 = vsel %vm1512_vm14, %v1502_v25, %v2954_v16  ;;  %v3650_v16 = vld [vmem:[#allocation6_spill] sm:$0xff] }
 0x23b   : > { %v1454_v57 = vsel %vm1444_vm9, %v1437_v56, %v2909_v55  ;;  %2361 = vmatprep.mubr.msk.f32.mxu1 %vm1541_vm15, %v1519_v23  ;;  %v1521_v55 = vsel %vm1512_vm14, %v1504_v5, %v3651_v58 }
 0x23c   : > { %v1471_v10 = vsel %vm1461_vm10, %v1454_v57, %v3648_v7  ;;  %v1177_v32 = vpop.permute.xlu0 %1176  ;;  %v1225_v12 = vpop.permute.xlu1 %1224 }
 0x23d   : > { %v1488_v41 = vsel %vm1478_vm12, %v1471_v10, %v3650_v16  ;;  %v1460_v47 = vsel %vm1444_vm9, %v3378_v54, %v1177_v32 }
 0x23e   : > { %2362 = vmatmul.mubr.msk.f32.gmra.mxu1 %vm1541_vm15, %v1520_v51  ;;  %v1505_v33 = vsel %vm1495_vm13, %v1488_v41, %v3652_v50 }
 0x23f   : > { %2364 = vmatprep.mubr.msk.f32.mxu1 %vm1541_vm15, %v1521_v55  ;;  %v1522_v37 = vsel %vm1512_vm14, %v1505_v33, %v3653_v0 }
 0x240   : > { %v1373_v35 = vpop.permute.xlu0 %1372  ;;  %v1227_v28 = vpop.permute.xlu1 %1226 }
 0x241   : > { %v1526_v14 = vsel %vm1512_vm14, %v1509_v46, %v1373_v35  ;;  %v1477_v30 = vsel %vm1461_vm10, %v1460_v47, %v1227_v28  ;;  %v3539_v46 = vld [vmem:[%s3635_s8] ss:$0 sm:$0xff] }
 0x242   : > { %2365 = vmatmul.mubr.msk.f32.gmra.mxu1 %vm1541_vm15, %v1522_v37 }
 0x243   : > { %2367 = vmatprep.mubr.msk.f32.mxu1 %vm1541_vm15, %v3287_v34  ;;  %v1476_v34 = vsel %vm1461_vm10, %v3383_v20, %v1225_v12  ;;  %v2205_v20 = vld [vmem:[%s3633_s6] ss:$0 sm:$0xff] }
 0x244   : > { %v1275_v52 = vpop.permute.xlu0 %1274  ;;  %v1277_v59 = vpop.permute.xlu1 %1276 }
 0x246   : > { %2368 = vmatmul.mubr.msk.f32.gmra.mxu1 %vm1541_vm15, %v3308_v2  ;;  %v1493_v2 = vsel %vm1478_vm12, %v1476_v34, %v1275_v52 }
 0x247   : > { %2370 = vmatprep.mubr.msk.f32.mxu1 %vm1541_vm15, %v3375_v42  ;;  %v1494_v42 = vsel %vm1478_vm12, %v1477_v30, %v1277_v59  ;;  %v2452_v30 = vld [vmem:[%s2618_s27 + $0x8] sm:$0xff] }
 0x248   : > { %v1325_v21 = vpop.permute.xlu0 %1324  ;;  %v1327_v53 = vpop.permute.xlu1 %1326 }
 0x249   : > { %v1510_v39 = vsel %vm1495_vm13, %v1493_v2, %v1325_v21  ;;  %v1511_v49 = vsel %vm1495_vm13, %v1494_v42, %v1327_v53 }
 0x24a   : > { %2371 = vmatmul.mubr.msk.f32.gmra.mxu1 %vm1541_vm15, %v1526_v14 }
 0x24c   : > { %v1375_v3 = vpop.permute.xlu0 %1374  ;;  %v1377_v13 = vpop.permute.xlu1 %1376 }
 0x24d   : > { %v1527_v54 = vsel %vm1512_vm14, %v1510_v39, %v1375_v3  ;;  %v1528_v36 = vsel %vm1512_vm14, %v1511_v49, %v1377_v13  ;;  %v2453_v39 = vld [vmem:[%s2618_s27] sm:$0xff] }
 0x24e   : > { %2373 = vmatprep.mubr.msk.f32.mxu1 %vm1541_vm15, %v1527_v54 }
 0x24f   : > { %2374 = vmatmul.mubr.msk.f32.gmra.mxu1 %vm1541_vm15, %v1528_v36 }
 0x2b2   : > { %v2354_v22 = vpop.f32.mrf.mxu1 }
 0x2b3   : > { %v1666_v31 = vadd.f32 %v2354_v22, %v2205_v20  ;;  %v2454_v22 = vld [vmem:[%s2618_s27 + $0x18] sm:$0xff] }
 0x2b4   : > { %v1660_v27 = vpop.f32.mrf.mxu1 }
 0x2b5   : > { %v1661_v18 = vadd.f32 %v2205_v20, %v1660_v27  ;;  %v1740_v17 = vmax.f32 %v1666_v31, 0.0 }
 0x2b7   : > { %v1739_v43 = vmax.f32 %v1661_v18, 0.0  ;;  %v2455_v18 = vld [vmem:[%s2618_s27 + $0x10] sm:$0xff] }
 0x2b9   : > { %2378 = vmatprep.mubr.msk.f32.mxu0 %vm1394_vm7, %v1739_v43 }
 0x2ba   : > { %2379 = vmatmul.mubr.msk.f32.vlgmr.msra.gmra.mxu0 %vm1394_vm7, %v1740_v17 }
 0x2de   : > { %v2357_v6 = vpop.f32.mrf.mxu1 }
 0x2df   : > { %v1676_v8 = vadd.f32 %v2357_v6, %v2205_v20 }
 0x2e0   : > { %v1670_v29 = vpop.f32.mrf.mxu1 }
 0x2e1   : > { %v1671_v48 = vadd.f32 %v2205_v20, %v1670_v29  ;;  %v1742_v15 = vmax.f32 %v1676_v8, 0.0 }
 0x2e3   : > { %v1741_v63 = vmax.f32 %v1671_v48, 0.0 }
 0x2e5   : > { %2381 = vmatprep.mubr.msk.f32.mxu0 %vm1394_vm7, %v1741_v63 }
 0x2e6   : > { %2382 = vmatmul.mubr.msk.f32.gmra.mxu0 %vm1394_vm7, %v1742_v15  ;;  %v2456_v15 = vld [vmem:[%s2618_s27 + $0x28] sm:$0xff] }
 0x2fa   : > { %v2360_v60 = vpop.f32.mrf.mxu1 }
 0x2fb   : > { %v1686_v38 = vadd.f32 %v2360_v60, %v2205_v20 }
 0x2fc   : > { %v1680_v4 = vpop.f32.mrf.mxu1 }
 0x2fd   : > { %v1681_v19 = vadd.f32 %v2205_v20, %v1680_v4  ;;  %v1744_v61 = vmax.f32 %v1686_v38, 0.0 }
 0x2fe   : > { %v2363_v40 = vpop.f32.mrf.mxu1 }
 0x2ff   : > { %v1743_v45 = vmax.f32 %v1681_v19, 0.0  ;;  %v1696_v44 = vadd.f32 %v2363_v40, %v2205_v20  ;;  %v2457_v40 = vld [vmem:[%s2618_s27 + $0x20] sm:$0xff] }
 0x300   : > { %v1690_v24 = vpop.f32.mrf.mxu1 }
 0x301   : > { %v1691_v62 = vadd.f32 %v2205_v20, %v1690_v24  ;;  %2384 = vmatprep.mubr.msk.f32.mxu0 %vm1394_vm7, %v1743_v45  ;;  %v1746_v56 = vmax.f32 %v1696_v44, 0.0 }
 0x302   : > { %v2366_v11 = vpop.f32.mrf.mxu1  ;;  %2385 = vmatmul.mubr.msk.f32.gmra.mxu0 %vm1394_vm7, %v1744_v61 }
 0x303   : > { %v1745_v25 = vmax.f32 %v1691_v62, 0.0  ;;  %v1706_v23 = vadd.f32 %v2366_v11, %v2205_v20  ;;  %v2458_v62 = vld [vmem:[%s2618_s27 + $0x38] sm:$0xff] }
 0x304   : > { %v1700_v26 = vpop.f32.mrf.mxu1 }
 0x305   : > { %v1701_v57 = vadd.f32 %v2205_v20, %v1700_v26  ;;  %2387 = vmatprep.mubr.msk.f32.mxu0 %vm1394_vm7, %v1745_v25  ;;  %v1748_v10 = vmax.f32 %v1706_v23, 0.0  ;;  %v2459_v26 = vld [vmem:[%s2618_s27 + $0x30] sm:$0xff] }
 0x306   : > { %v2369_v5 = vpop.f32.mrf.mxu1  ;;  %2388 = vmatmul.mubr.msk.f32.gmra.mxu0 %vm1394_vm7, %v1746_v56 }
 0x307   : > { %v1747_v7 = vmax.f32 %v1701_v57, 0.0  ;;  %v1716_v32 = vadd.f32 %v2369_v5, %v2205_v20 }
 0x308   : > { %v1710_v12 = vpop.f32.mrf.mxu1 }
 0x309   : > { %v1711_v9 = vadd.f32 %v2205_v20, %v1710_v12  ;;  %2390 = vmatprep.mubr.msk.f32.mxu0 %vm1394_vm7, %v1747_v7  ;;  %v1750_v41 = vmax.f32 %v1716_v32, 0.0  ;;  %v2460_v32 = vld [vmem:[%s2618_s27 + $0x48] sm:$0xff] }
 0x30a   : > { %v2372_v51 = vpop.f32.mrf.mxu1  ;;  %2391 = vmatmul.mubr.msk.f32.gmra.mxu0 %vm1394_vm7, %v1748_v10 }
 0x30b   : > { %v1749_v16 = vmax.f32 %v1711_v9, 0.0  ;;  %v1726_v58 = vadd.f32 %v2372_v51, %v2205_v20 }
 0x30c   : > { %v1720_v55 = vpop.f32.mrf.mxu1 }
 0x30d   : > { %v1721_v50 = vadd.f32 %v2205_v20, %v1720_v55  ;;  %2393 = vmatprep.mubr.msk.f32.mxu0 %vm1394_vm7, %v1749_v16  ;;  %v1752_v28 = vmax.f32 %v1726_v58, 0.0 }
 0x30e   : > { %2394 = vmatmul.mubr.msk.f32.gmra.mxu0 %vm1394_vm7, %v1750_v41  ;;  %v2461_v41 = vld [vmem:[%s2618_s27 + $0x40] sm:$0xff] }
 0x30f   : > { %v1751_v33 = vmax.f32 %v1721_v50, 0.0  ;;  %v2375_v35 = vpop.f32.mrf.mxu1 }
 0x310   : > { %v1736_v0 = vadd.f32 %v2375_v35, %v2205_v20  ;;  %v2462_v35 = vld [vmem:[%s2618_s27 + $0x58] sm:$0xff] }
 0x311   : > { %v1730_v37 = vpop.f32.mrf.mxu1  ;;  %2396 = vmatprep.mubr.msk.f32.mxu0 %vm1394_vm7, %v1751_v33 }
 0x312   : > { %v1731_v52 = vadd.f32 %v2205_v20, %v1730_v37  ;;  %2397 = vmatmul.mubr.msk.f32.gmra.mxu0 %vm1394_vm7, %v1752_v28  ;;  %v1754_v1 = vmax.f32 %v1736_v0, 0.0 }
 0x314   : > { %v1753_v59 = vmax.f32 %v1731_v52, 0.0 }
 0x316   : > { %2399 = vmatprep.mubr.msk.f32.mxu0 %vm1394_vm7, %v1753_v59  ;;  %v2463_v59 = vld [vmem:[%s2618_s27 + $0x50] sm:$0xff] }
 0x317   : > { %2400 = vmatmul.mubr.msk.f32.gmra.mxu0 %vm1394_vm7, %v1754_v1 }
 0x37a   : > { %v2380_v21 = vpop.f32.mrf.mxu0 }
 0x37b   : > { %v1886_v53 = vadd.f32 %v2380_v21, %v3539_v46 }
 0x37c   : > { %v1880_v47 = vpop.f32.mrf.mxu0 }
 0x37d   : > { %v1960_v14 = vmax.f32 %v1886_v53, 0.0  ;;  %v1881_v34 = vadd.f32 %v3539_v46, %v1880_v47  ;;  %v2464_v47 = vld [vmem:[%s2618_s27 + $0x68] sm:$0xff] }
 0x37f   : > { %v1976_v2 = vadd.f32 %v2452_v30, %v1960_v14  ;;  %v1959_v42 = vmax.f32 %v1881_v34, 0.0 }
 0x381   : > { %1992 = vst.msk [vmem:[%s3548_s16 + $0x8] sm:$0xff] %vm529_vm0, %v1976_v2  ;;  %v1975_v49 = vadd.f32 %v2453_v39, %v1959_v42  ;;  %v2465_v42 = vld [vmem:[%s2618_s27 + $0x60] sm:$0xff] }
 0x383   : > { %1991 = vst.msk [vmem:[%s3548_s16] sm:$0xff] %vm529_vm0, %v1975_v49 }
 0x3a6   : > { %v2383_v3 = vpop.f32.mrf.mxu0 }
 0x3a7   : > { %v1896_v13 = vadd.f32 %v2383_v3, %v3539_v46 }
 0x3a8   : > { %v1890_v54 = vpop.f32.mrf.mxu0 }
 0x3a9   : > { %v1962_v36 = vmax.f32 %v1896_v13, 0.0  ;;  %v1891_v20 = vadd.f32 %v3539_v46, %v1890_v54  ;;  %v2466_v54 = vld [vmem:[%s2618_s27 + $0x78] sm:$0xff] }
 0x3ab   : > { %v1978_v31 = vadd.f32 %v2454_v22, %v1962_v36  ;;  %v1961_v27 = vmax.f32 %v1891_v20, 0.0  ;;  %v2467_v22 = vld [vmem:[%s2618_s27 + $0x70] sm:$0xff] }
 0x3ad   : > { %1994 = vst.msk [vmem:[%s3548_s16 + $0x18] sm:$0xff] %vm529_vm0, %v1978_v31  ;;  %v1977_v43 = vadd.f32 %v2455_v18, %v1961_v27 }
 0x3af   : > { %1993 = vst.msk [vmem:[%s3548_s16 + $0x10] sm:$0xff] %vm529_vm0, %v1977_v43 }
 0x3c2   : > { %v2386_v17 = vpop.f32.mrf.mxu0 }
 0x3c3   : > { %v1906_v6 = vadd.f32 %v2386_v17, %v3539_v46 }
 0x3c4   : > { %v1900_v8 = vpop.f32.mrf.mxu0 }
 0x3c5   : > { %v1964_v29 = vmax.f32 %v1906_v6, 0.0  ;;  %v1901_v48 = vadd.f32 %v3539_v46, %v1900_v8 }
 0x3c6   : > { %v2389_v63 = vpop.f32.mrf.mxu0 }
 0x3c7   : > { %v1980_v60 = vadd.f32 %v2456_v15, %v1964_v29  ;;  %v1963_v38 = vmax.f32 %v1901_v48, 0.0  ;;  %v1916_v4 = vadd.f32 %v2389_v63, %v3539_v46 }
 0x3c8   : > { %v1910_v19 = vpop.f32.mrf.mxu0 }
 0x3c9   : > { %1996 = vst.msk [vmem:[%s3548_s16 + $0x28] sm:$0xff] %vm529_vm0, %v1980_v60  ;;  %v1979_v45 = vadd.f32 %v2457_v40, %v1963_v38  ;;  %v1966_v61 = vmax.f32 %v1916_v4, 0.0  ;;  %v1911_v44 = vadd.f32 %v3539_v46, %v1910_v19 }
 0x3ca   : > { %v2392_v24 = vpop.f32.mrf.mxu0 }
 0x3cb   : > { %1995 = vst.msk [vmem:[%s3548_s16 + $0x20] sm:$0xff] %vm529_vm0, %v1979_v45  ;;  %v1982_v11 = vadd.f32 %v2458_v62, %v1966_v61  ;;  %v1965_v25 = vmax.f32 %v1911_v44, 0.0  ;;  %v1926_v56 = vadd.f32 %v2392_v24, %v3539_v46 }
 0x3cc   : > { %v1920_v23 = vpop.f32.mrf.mxu0 }
 0x3cd   : > { %1998 = vst.msk [vmem:[%s3548_s16 + $0x38] sm:$0xff] %vm529_vm0, %v1982_v11  ;;  %v1981_v57 = vadd.f32 %v2459_v26, %v1965_v25  ;;  %v1968_v5 = vmax.f32 %v1926_v56, 0.0  ;;  %v1921_v7 = vadd.f32 %v3539_v46, %v1920_v23 }
 0x3ce   : > { %v2395_v10 = vpop.f32.mrf.mxu0 }
 0x3cf   : > { %1997 = vst.msk [vmem:[%s3548_s16 + $0x30] sm:$0xff] %vm529_vm0, %v1981_v57  ;;  %v1984_v12 = vadd.f32 %v2460_v32, %v1968_v5  ;;  %v1967_v9 = vmax.f32 %v1921_v7, 0.0  ;;  %v1936_v51 = vadd.f32 %v2395_v10, %v3539_v46 }
 0x3d0   : > { %v1930_v16 = vpop.f32.mrf.mxu0 }
 0x3d1   : > { %2000 = vst.msk [vmem:[%s3548_s16 + $0x48] sm:$0xff] %vm529_vm0, %v1984_v12  ;;  %v1983_v58 = vadd.f32 %v2461_v41, %v1967_v9  ;;  %v1970_v55 = vmax.f32 %v1936_v51, 0.0  ;;  %v1931_v50 = vadd.f32 %v3539_v46, %v1930_v16 }
 0x3d2   : > { %v2398_v33 = vpop.f32.mrf.mxu0 }
 0x3d3   : > { %1999 = vst.msk [vmem:[%s3548_s16 + $0x40] sm:$0xff] %vm529_vm0, %v1983_v58  ;;  %v1986_v28 = vadd.f32 %v2462_v35, %v1970_v55  ;;  %v1969_v0 = vmax.f32 %v1931_v50, 0.0  ;;  %v1946_v37 = vadd.f32 %v2398_v33, %v3539_v46 }
 0x3d4   : > { %v1940_v52 = vpop.f32.mrf.mxu0 }
 0x3d5   : > { %2002 = vst.msk [vmem:[%s3548_s16 + $0x58] sm:$0xff] %vm529_vm0, %v1986_v28  ;;  %v1985_v1 = vadd.f32 %v2463_v59, %v1969_v0  ;;  %v1972_v21 = vmax.f32 %v1946_v37, 0.0  ;;  %v1941_v53 = vadd.f32 %v3539_v46, %v1940_v52 }
 0x3d7   : > { %2001 = vst.msk [vmem:[%s3548_s16 + $0x50] sm:$0xff] %vm529_vm0, %v1985_v1  ;;  %v1988_v14 = vadd.f32 %v2464_v47, %v1972_v21  ;;  %v1971_v34 = vmax.f32 %v1941_v53, 0.0  ;;  %v2401_v30 = vpop.f32.mrf.mxu0 }
 0x3d8   : > { %v1956_v2 = vadd.f32 %v2401_v30, %v3539_v46 }
 0x3d9   : > { %2004 = vst.msk [vmem:[%s3548_s16 + $0x68] sm:$0xff] %vm529_vm0, %v1988_v14  ;;  %v1987_v39 = vadd.f32 %v2465_v42, %v1971_v34  ;;  %v1950_v49 = vpop.f32.mrf.mxu0 }
 0x3da   : > { %v1974_v3 = vmax.f32 %v1956_v2, 0.0  ;;  %v1951_v13 = vadd.f32 %v3539_v46, %v1950_v49 }
 0x3db   : > { %2003 = vst.msk [vmem:[%s3548_s16 + $0x60] sm:$0xff] %vm529_vm0, %v1987_v39 }
 0x3dc   : > { %v1990_v36 = vadd.f32 %v2466_v54, %v1974_v3  ;;  %v1973_v20 = vmax.f32 %v1951_v13, 0.0 }
 0x3de   : > { %2006 = vst.msk [vmem:[%s3548_s16 + $0x78] sm:$0xff] %vm529_vm0, %v1990_v36  ;;  %v1989_v31 = vadd.f32 %v2467_v22, %v1973_v20 }
 0x3e0   : > { %2005 = vst.msk [vmem:[%s3548_s16 + $0x70] sm:$0xff] %vm529_vm0, %v1989_v31 }
 0x3e1 PF: > { %s19_s13 = sadd.s32 1, %s2506_s13   ;;  %s3656_s30 = smov %s2498_s11 }
 0x3e2   : > { %p16_p12 = scmp.ge.s32.totalorder %s19_s13, 6   ;;  %s3657_s10 = smov %s2502_s12 }
 0x3e3   : > { %s3658_s11 = smov %s3661_s14  ;;  %s3659_s12 = smov %s3665_s15 }
 0x3e4   :  { %18 = sbr.rel (!%p16_p12) target bundleno = 3 (0x3), region = 92 }

</bundles_post_ra>
